<compile_context>
chip_gen: v7x
topology: tpu7x:2x2x1
jax: 0.10.0
libtpu: 0.0.40
codegen_flags: <defaults>
</compile_context>

<pallas_src>
import jax
import jax.numpy as jnp
import numpy as np
from jax.experimental import pallas as pl
from jax.experimental.pallas import tpu as pltpu

_LANE = 128   # lane width / channel padding
_TM = 256     # destination-node rows per tile
_TK = 512     # source-node (reduction) columns per tile; multiple of _TM


def _round_up(v, m):
    return (v + m - 1) // m * m


# ---------------------------------------------------------------------------
# Pallas kernels
# ---------------------------------------------------------------------------
def _make_sage_kernel(tm, cin_pad):
    """Fused SAGEConv layer: tiled aggregation matmul + fused lin_l/lin_r + ReLU.

    acc scratch layout: [:, :cin_pad]  = running sum_j A[i, j] * x[j]   (f32)
                        [:, cin_pad:]  = x[i]                           (f32)
    so the epilogue is a single  acc @ [W_l ; W_r]  MXU pass.
    """

    def kernel(a_ref, inv_ref, xk_ref, xi_ref, w_ref, b_ref, o_ref, acc_ref):
        k = pl.program_id(1)

        @pl.when(k == 0)
        def _init():
            acc_ref[:, :cin_pad] = jnp.zeros((tm, cin_pad), jnp.float32)
            acc_ref[:, cin_pad:] = xi_ref[...].astype(jnp.float32)

        # aggregation partial sum: (tm, tk) bf16 @ (tk, cin_pad) bf16 -> f32
        acc_ref[:, :cin_pad] = acc_ref[:, :cin_pad] + jnp.dot(
            a_ref[...], xk_ref[...], preferred_element_type=jnp.float32)

        @pl.when(k == pl.num_programs(1) - 1)
        def _finalize():
            # mean aggregation: scale by 1/in-degree (free VPU op under the MXU epilogue)
            acc_ref[:, :cin_pad] = acc_ref[:, :cin_pad] * inv_ref[...]
            out = jnp.dot(acc_ref[...], w_ref[...],
                          preferred_element_type=jnp.float32) + b_ref[...]
            o_ref[...] = jnp.maximum(out, 0.0).astype(o_ref.dtype)

    return kernel


def _make_final_kernel(num_feats):
    """Final Linear over the (virtual) concat of `num_feats` feature blocks."""

    def kernel(*refs):
        feat_refs = refs[:num_feats]
        w_ref = refs[num_feats]
        b_ref = refs[num_feats + 1]
        o_ref = refs[num_feats + 2]

        acc = None
        off = 0
        for r in feat_refs:
            c = r.shape[-1]
            part = jnp.dot(r[...].astype(jnp.float32), w_ref[off:off + c, :],
                           preferred_element_type=jnp.float32)
            acc = part if acc is None else acc + part
            off += c
        o_ref[...] = acc + b_ref[...]

    return kernel


# ---------------------------------------------------------------------------
# Kernel wrappers
# ---------------------------------------------------------------------------
def sage_layer(adj_p, inv_p, x_p, w_fused, b):
    """relu(SAGEConv(x)). adj_p: (Np, Np) bf16 counts, x_p: (Np, Cin_pad) bf16."""
    n_pad = adj_p.shape[0]
    cin_pad = x_p.shape[1]
    cout_pad = w_fused.shape[1]
    grid = (n_pad // _TM, n_pad // _TK)

    return pl.pallas_call(
        _make_sage_kernel(_TM, cin_pad),
        out_shape=jax.ShapeDtypeStruct((n_pad, cout_pad), jnp.bfloat16),
        grid_spec=pltpu.PrefetchScalarGridSpec(
            num_scalar_prefetch=0,
            grid=grid,
            in_specs=[
                pl.BlockSpec((_TM, _TK), lambda i, k: (i, k)),        # A tile
                pl.BlockSpec((_TM, 1), lambda i, k: (i, 0)),          # 1/deg rows
                pl.BlockSpec((_TK, cin_pad), lambda i, k: (k, 0)),    # x (source rows)
                pl.BlockSpec((_TM, cin_pad), lambda i, k: (i, 0)),    # x (root rows)
                pl.BlockSpec((2 * cin_pad, cout_pad), lambda i, k: (0, 0)),  # fused W (resident)
                pl.BlockSpec((1, cout_pad), lambda i, k: (0, 0)),     # bias (resident)
            ],
            out_specs=pl.BlockSpec((_TM, cout_pad), lambda i, k: (i, 0)),
            scratch_shapes=[pltpu.VMEM((_TM, 2 * cin_pad), jnp.float32)],
        ),
        compiler_params=pltpu.CompilerParams(
            dimension_semantics=("parallel", "arbitrary")),
    )(adj_p, inv_p, x_p, x_p, w_fused, b)


def final_linear(feats, w, b):
    """Linear over the channel-concat of `feats` without materializing the concat."""
    n_pad = feats[0].shape[0]
    cout_pad = w.shape[1]
    grid = (n_pad // _TM,)

    in_specs = [pl.BlockSpec((_TM, f.shape[1]), lambda i: (i, 0)) for f in feats]
    in_specs += [pl.BlockSpec(w.shape, lambda i: (0, 0)),     # weight resident
                 pl.BlockSpec((1, cout_pad), lambda i: (0, 0))]

    return pl.pallas_call(
        _make_final_kernel(len(feats)),
        out_shape=jax.ShapeDtypeStruct((n_pad, cout_pad), jnp.float32),
        grid_spec=pltpu.PrefetchScalarGridSpec(
            num_scalar_prefetch=0,
            grid=grid,
            in_specs=in_specs,
            out_specs=pl.BlockSpec((_TM, cout_pad), lambda i: (i, 0)),
        ),
        compiler_params=pltpu.CompilerParams(dimension_semantics=("parallel",)),
    )(*feats, w, b)


# ---------------------------------------------------------------------------
# Parameters (logical, unpadded) + kernel-side padded/fused parameters
# ---------------------------------------------------------------------------
def _glorot(key, fan_in, fan_out):
    bound = (6.0 / (fan_in + fan_out)) ** 0.5
    return jax.random.uniform(key, (fan_in, fan_out), jnp.float32, -bound, bound)


def init_graphsage_params(key, in_channels, out_channels, num_layers, cat=True, lin=True):
    params = {"convs": []}
    for i in range(num_layers):
        c_in = in_channels if i == 0 else out_channels
        key, k1, k2 = jax.random.split(key, 3)
        params["convs"].append({
            "w_l": _glorot(k1, c_in, out_channels),            # aggr path (has bias)
            "b_l": jnp.zeros((1, out_channels), jnp.float32),
            "w_r": _glorot(k2, c_in, out_channels),            # root path (no bias)
        })
    if lin:
        final_in = in_channels + num_layers * out_channels if cat else out_channels
        key, k3 = jax.random.split(key)
        params["final_w"] = _glorot(k3, final_in, out_channels)
        params["final_b"] = jnp.zeros((1, out_channels), jnp.float32)
    return params


def prepare_kernel_params(params, in_channels, out_channels, num_layers, cat=True, lin=True):
    """Pad channel dims to 128 lanes and fuse [W_l ; W_r] per layer."""
    cin0_pad = _round_up(in_channels, _LANE)
    cout_pad = _round_up(out_channels, _LANE)
    kp = {"convs": []}
    for i, layer in enumerate(params["convs"]):
        c_in = in_channels if i == 0 else out_channels
        c_in_pad = cin0_pad if i == 0 else cout_pad
        w_f = jnp.zeros((2 * c_in_pad, cout_pad), jnp.float32)
        w_f = w_f.at[:c_in, :out_channels].set(layer["w_l"])
        w_f = w_f.at[c_in_pad:c_in_pad + c_in, :out_channels].set(layer["w_r"])
        b_p = jnp.zeros((1, cout_pad), jnp.float32).at[:, :out_channels].set(layer["b_l"])
        kp["convs"].append({"w": w_f, "b": b_p})
    if lin:
        if cat:
            seg_pads = [cin0_pad] + [cout_pad] * num_layers
            seg_sizes = [in_channels] + [out_channels] * num_layers
        else:
            seg_pads = [cout_pad]
            seg_sizes = [out_channels]
        w_fin = jnp.zeros((sum(seg_pads), cout_pad), jnp.float32)
        off_p = off = 0
        for sp, s in zip(seg_pads, seg_sizes):
            w_fin = w_fin.at[off_p:off_p + s, :out_channels].set(
                params["final_w"][off:off + s])
            off_p += sp
            off += s
        kp["final_w"] = w_fin
        kp["final_b"] = jnp.zeros((1, cout_pad), jnp.float32).at[
            :, :out_channels].set(params["final_b"])
    return kp


# ---------------------------------------------------------------------------
# Forward pass (mirrors GraphSAGE.forward with cat=True, lin=True, dropout=0.0)
# ---------------------------------------------------------------------------
def graphsage_forward(kparams, x, edge_index, *, out_channels, cat=True, lin=True):
    n, cin = x.shape
    cin_pad = _round_up(cin, _LANE)
    n_pad = _round_up(n, _TK)           # _TK is a multiple of _TM

    # Unnormalized adjacency counts A[dst, src] (bf16) + 1/in-degree (f32, in-kernel scale).
    src, dst = edge_index[0], edge_index[1]
    adj = jnp.zeros((n, n), jnp.float32).at[dst, src].add(1.0)
    inv_deg = 1.0 / jnp.maximum(adj.sum(axis=1, keepdims=True), 1.0)

    adj_p = jnp.zeros((n_pad, n_pad), jnp.bfloat16).at[:n, :n].set(adj.astype(jnp.bfloat16))
    inv_p = jnp.zeros((n_pad, 1), jnp.float32).at[:n, :].set(inv_deg)
    x_p = jnp.zeros((n_pad, cin_pad), jnp.bfloat16).at[:n, :cin].set(x.astype(jnp.bfloat16))

    xs = [x_p]
    for layer in kparams["convs"]:
        xs.append(sage_layer(adj_p, inv_p, xs[-1], layer["w"], layer["b"]))

    feats = xs if cat else [xs[-1]]
    if lin:
        out_p = final_linear(feats, kparams["final_w"], kparams["final_b"])
        return out_p[:n, :out_channels]

    # lin=False path (not the hot path): slice padding and concat in plain JAX.
    cols = ([cin] + [out_channels] * len(kparams["convs"])) if cat else [out_channels]
    parts = [f[:n, :c].astype(jnp.float32) for f, c in zip(feats, cols)]
    return jnp.concatenate(parts, axis=-1)


# ---------------------------------------------------------------------------
# Pure numpy reference (float64); mimics only the deliberate bf16 storage of
# the input features and inter-layer activations.
# ---------------------------------------------------------------------------
def _bf16_round(a):
    return np.asarray(jnp.asarray(a, jnp.float32).astype(jnp.bfloat16).astype(jnp.float32),
                      dtype=np.float64)


def reference_forward(params, x, edge_index, cat=True, lin=True):
    x = np.asarray(x, np.float64)
    ei = np.asarray(edge_index)
    n = x.shape[0]
    adj = np.zeros((n, n), np.float64)
    np.add.at(adj, (ei[1], ei[0]), 1.0)
    inv_deg = 1.0 / np.maximum(adj.sum(axis=1, keepdims=True), 1.0)

    xs = [_bf16_round(x)]
    for layer in params["convs"]:
        aggr = (adj @ xs[-1]) * inv_deg
        h = (aggr @ np.asarray(layer["w_l"], np.float64)
             + np.asarray(layer["b_l"], np.float64)
             + xs[-1] @ np.asarray(layer["w_r"], np.float64))
        xs.append(_bf16_round(np.maximum(h, 0.0)))
    h = np.concatenate(xs, axis=-1) if cat else xs[-1]
    if lin:
        h = h @ np.asarray(params["final_w"], np.float64) + np.asarray(params["final_b"], np.float64)
    return h


# ---------------------------------------------------------------------------
if __name__ == "__main__":
    N = 64
    E = 256
    IN_CHANNELS = 16
    OUT_CHANNELS = 32
    NUM_LAYERS = 2

    key = jax.random.PRNGKey(0)
    kx, ke, kp = jax.random.split(key, 3)

    x = jax.random.normal(kx, (N, IN_CHANNELS), jnp.float32)
    edge_index = jax.random.randint(ke, (2, E), 0, N, dtype=jnp.int32)
    # edge_attr is unused by GraphSAGE.forward (SAGEConv takes only x, edge_index)
    edge_attr = jax.random.normal(jax.random.PRNGKey(1), (E, 4), jnp.float32)

    params = init_graphsage_params(kp, IN_CHANNELS, OUT_CHANNELS, NUM_LAYERS,
                                   cat=True, lin=True)
    kparams = prepare_kernel_params(params, IN_CHANNELS, OUT_CHANNELS, NUM_LAYERS,
                                    cat=True, lin=True)

    out = graphsage_forward(kparams, x, edge_index, out_channels=OUT_CHANNELS,
                            cat=True, lin=True)
    jax.block_until_ready(out)
    assert out.shape == (N, OUT_CHANNELS), out.shape

    ref = reference_forward(params, x, edge_index, cat=True, lin=True)
    np.testing.assert_allclose(np.asarray(out, np.float64), ref, rtol=2e-2, atol=2e-2)

    print("KERNEL_OK")
</pallas_src>

<mosaic_0001>
module attributes {stable_mosaic.version = 11 : i64} {
  func.func @kernel(%arg0: i32, %arg1: i32, %arg2: memref<256x512xbf16, #tpu.memory_space<vmem>>, %arg3: memref<256x1xf32, #tpu.memory_space<vmem>>, %arg4: memref<512x128xbf16, #tpu.memory_space<vmem>>, %arg5: memref<256x128xbf16, #tpu.memory_space<vmem>>, %arg6: memref<256x128xf32, #tpu.memory_space<vmem>>, %arg7: memref<1x128xf32, #tpu.memory_space<vmem>>, %arg8: memref<256x128xbf16, #tpu.memory_space<vmem>>, %arg9: memref<256x256xf32, #tpu.memory_space<vmem>>) attributes {dimension_semantics = [#tpu.dimension_semantics<parallel>, #tpu.dimension_semantics<arbitrary>], iteration_bounds = array<i64: 2, 1>, scalar_prefetch = 0 : i64, scratch_operands = 1 : i64, tpu.core_type = #tpu.core_type<tc>, window_params = [{transform_indices = @transform_0, window_bounds = array<i64: 256, 512>}, {transform_indices = @transform_1, window_bounds = array<i64: 256, 1>}, {transform_indices = @transform_2, window_bounds = array<i64: 512, 128>}, {transform_indices = @transform_3, window_bounds = array<i64: 256, 128>}, {pipeline_mode = #tpu.pipeline_mode<synchronous>, transform_indices = @transform_4, window_bounds = array<i64: 256, 128>}, {pipeline_mode = #tpu.pipeline_mode<synchronous>, transform_indices = @transform_5, window_bounds = array<i64: 1, 128>}, {transform_indices = @transform_6, window_bounds = array<i64: 256, 128>}]} {
    %c0_i32 = arith.constant 0 : i32
    %0 = arith.cmpi eq, %arg1, %c0_i32 : i32
    %1 = arith.extui %0 : i1 to i32
    %c0_i32_0 = arith.constant 0 : i32
    %2 = arith.cmpi ne, %1, %c0_i32_0 : i32
    scf.if %2 {
      %cst_10 = arith.constant 0.000000e+00 : f32
      %12 = vector.broadcast %cst_10 : f32 to vector<256x128xf32>
      %c0_11 = arith.constant 0 : index
      %c0_12 = arith.constant 0 : index
      %13 = vector.load %arg9[%c0_11, %c0_12] : memref<256x256xf32, #tpu.memory_space<vmem>>, vector<256x128xf32>
      tpu.vector_store %arg9[%c0_11, %c0_12], %12 {strides = array<i32>} : memref<256x256xf32, #tpu.memory_space<vmem>>, vector<256x128xf32>,
      %c0_13 = arith.constant 0 : index
      %c0_14 = arith.constant 0 : index
      %14 = vector.load %arg5[%c0_13, %c0_14] : memref<256x128xbf16, #tpu.memory_space<vmem>>, vector<256x128xbf16>
      %15 = arith.extf %14 : vector<256x128xbf16> to vector<256x128xf32>
      %c0_15 = arith.constant 0 : index
      %c128 = arith.constant 128 : index
      %16 = vector.load %arg9[%c0_15, %c128] : memref<256x256xf32, #tpu.memory_space<vmem>>, vector<256x128xf32>
      tpu.vector_store %arg9[%c0_15, %c128], %15 {strides = array<i32>} : memref<256x256xf32, #tpu.memory_space<vmem>>, vector<256x128xf32>,
    } else {
    }
    %c0 = arith.constant 0 : index
    %c0_1 = arith.constant 0 : index
    %3 = vector.load %arg9[%c0, %c0_1] : memref<256x256xf32, #tpu.memory_space<vmem>>, vector<256x128xf32>
    %c0_2 = arith.constant 0 : index
    %c0_3 = arith.constant 0 : index
    %4 = vector.load %arg2[%c0_2, %c0_3] : memref<256x512xbf16, #tpu.memory_space<vmem>>, vector<256x512xbf16>
    %c0_4 = arith.constant 0 : index
    %c0_5 = arith.constant 0 : index
    %5 = vector.load %arg4[%c0_4, %c0_5] : memref<512x128xbf16, #tpu.memory_space<vmem>>, vector<512x128xbf16>
    %cst = arith.constant dense<0.000000e+00> : vector<256x128xf32>
    %6 = tpu.matmul %4, %5, %cst {dimension_numbers = #tpu.dot_dimension_numbers<[1], [0], [0], [1], [0, 0, 1, 1], [], []>} : vector<256x512xbf16>, vector<512x128xbf16>, vector<256x128xf32> -> vector<256x128xf32>
    %7 = arith.addf %3, %6 : vector<256x128xf32>
    %c0_6 = arith.constant 0 : index
    %c0_7 = arith.constant 0 : index
    %8 = vector.load %arg9[%c0_6, %c0_7] : memref<256x256xf32, #tpu.memory_space<vmem>>, vector<256x128xf32>
    tpu.vector_store %arg9[%c0_6, %c0_7], %7 {strides = array<i32>} : memref<256x256xf32, #tpu.memory_space<vmem>>, vector<256x128xf32>,
    %c0_i32_8 = arith.constant 0 : i32
    %9 = arith.cmpi eq, %arg1, %c0_i32_8 : i32
    %10 = arith.extui %9 : i1 to i32
    %c0_i32_9 = arith.constant 0 : i32
    %11 = arith.cmpi ne, %10, %c0_i32_9 : i32
    scf.if %11 {
      %c0_10 = arith.constant 0 : index
      %c0_11 = arith.constant 0 : index
      %12 = vector.load %arg9[%c0_10, %c0_11] : memref<256x256xf32, #tpu.memory_space<vmem>>, vector<256x128xf32>
      %c0_12 = arith.constant 0 : index
      %c0_13 = arith.constant 0 : index
      %13 = vector.load %arg3[%c0_12, %c0_13] : memref<256x1xf32, #tpu.memory_space<vmem>>, vector<256x1xf32>
      %14 = vector.broadcast %13 : vector<256x1xf32> to vector<256x128xf32>
      %15 = arith.mulf %12, %14 : vector<256x128xf32>
      %c0_14 = arith.constant 0 : index
      %c0_15 = arith.constant 0 : index
      %16 = vector.load %arg9[%c0_14, %c0_15] : memref<256x256xf32, #tpu.memory_space<vmem>>, vector<256x128xf32>
      tpu.vector_store %arg9[%c0_14, %c0_15], %15 {strides = array<i32>} : memref<256x256xf32, #tpu.memory_space<vmem>>, vector<256x128xf32>,
      %c0_16 = arith.constant 0 : index
      %c0_17 = arith.constant 0 : index
      %17 = vector.load %arg9[%c0_16, %c0_17] : memref<256x256xf32, #tpu.memory_space<vmem>>, vector<256x256xf32>
      %c0_18 = arith.constant 0 : index
      %c0_19 = arith.constant 0 : index
      %18 = vector.load %arg6[%c0_18, %c0_19] : memref<256x128xf32, #tpu.memory_space<vmem>>, vector<256x128xf32>
      %cst_20 = arith.constant dense<0.000000e+00> : vector<256x128xf32>
      %19 = tpu.matmul %17, %18, %cst_20 {dimension_numbers = #tpu.dot_dimension_numbers<[1], [0], [0], [1], [0, 0, 1, 1], [], []>} : vector<256x256xf32>, vector<256x128xf32>, vector<256x128xf32> -> vector<256x128xf32>
      %c0_21 = arith.constant 0 : index
      %c0_22 = arith.constant 0 : index
      %20 = vector.load %arg7[%c0_21, %c0_22] : memref<1x128xf32, #tpu.memory_space<vmem>>, vector<1x128xf32>
      %21 = vector.broadcast %20 : vector<1x128xf32> to vector<256x128xf32>
      %22 = arith.addf %19, %21 : vector<256x128xf32>
      %cst_23 = arith.constant 0.000000e+00 : f32
      %23 = vector.broadcast %cst_23 : f32 to vector<256x128xf32>
      %24 = arith.maximumf %22, %23 : vector<256x128xf32>
      %25 = arith.truncf %24 : vector<256x128xf32> to vector<256x128xbf16>
      %c0_24 = arith.constant 0 : index
      %c0_25 = arith.constant 0 : index
      %26 = vector.load %arg8[%c0_24, %c0_25] : memref<256x128xbf16, #tpu.memory_space<vmem>>, vector<256x128xbf16>
      tpu.vector_store %arg8[%c0_24, %c0_25], %25 {strides = array<i32>} : memref<256x128xbf16, #tpu.memory_space<vmem>>, vector<256x128xbf16>,
    } else {
    }
    return
  }
  func.func @transform_0(%arg0: i32, %arg1: i32) -> (i32, i32) {
    %c0_i32 = arith.constant 0 : i32
    return %arg0, %arg1 : i32, i32
  }
  func.func @transform_1(%arg0: i32, %arg1: i32) -> (i32, i32) {
    %c0_i32 = arith.constant 0 : i32
    %c0_i32_0 = arith.constant 0 : i32
    return %arg0, %c0_i32 : i32, i32
  }
  func.func @transform_2(%arg0: i32, %arg1: i32) -> (i32, i32) {
    %c0_i32 = arith.constant 0 : i32
    %c0_i32_0 = arith.constant 0 : i32
    return %arg1, %c0_i32 : i32, i32
  }
  func.func @transform_3(%arg0: i32, %arg1: i32) -> (i32, i32) {
    %c0_i32 = arith.constant 0 : i32
    %c0_i32_0 = arith.constant 0 : i32
    return %arg0, %c0_i32 : i32, i32
  }
  func.func @transform_4(%arg0: i32, %arg1: i32) -> (i32, i32) {
    %c0_i32 = arith.constant 0 : i32
    %c0_i32_0 = arith.constant 0 : i32
    %c0_i32_1 = arith.constant 0 : i32
    return %c0_i32, %c0_i32_0 : i32, i32
  }
  func.func @transform_5(%arg0: i32, %arg1: i32) -> (i32, i32) {
    %c0_i32 = arith.constant 0 : i32
    %c0_i32_0 = arith.constant 0 : i32
    %c0_i32_1 = arith.constant 0 : i32
    return %c0_i32, %c0_i32_0 : i32, i32
  }
  func.func @transform_6(%arg0: i32, %arg1: i32) -> (i32, i32) {
    %c0_i32 = arith.constant 0 : i32
    %c0_i32_0 = arith.constant 0 : i32
    return %arg0, %c0_i32 : i32, i32
  }
}

</mosaic_0001>

<bundles_post_ra>
// kernel: tpu_custom_call.1
= control target key start
LH: loop header
LB: loop body
LE: loop exit
PB: predicated region body
PF: predicated region fallthrough
CT: control target
= control target key end

     0   :  { %11 = vsyncpa [#allocation4], 0  ;;  %s4189_s0 = inlined_call_operand.hbm [shape: bf16[512,512], index: 0, kind: input, shape index: {}]   ;;  %s4190_s1 = inlined_call_operand.vmem [shape: f32[512,1], index: 1, kind: input, shape index: {}]   ;;  %s4191_s2 = inlined_call_operand.vmem [shape: bf16[512,128], index: 2, kind: input, shape index: {}]   ;;  %s4192_s3 = inlined_call_operand.vmem [shape: bf16[512,128], index: 3, kind: input, shape index: {}]   ;;  %s4193_s4 = inlined_call_operand.hbm [shape: f32[256,128], index: 4, kind: input, shape index: {}]   ;;  %s4194_s5 = inlined_call_operand.vmem [shape: f32[1,128], index: 5, kind: input, shape index: {}]   ;;  %s4195_s6 = inlined_call_operand.hbm [shape: bf16[512,128], index: 6, kind: output, shape index: {}]  }
   0x1   :  { %13 = vsyncpa [#allocation4 + $0x1], 0 }
   0x2   :  { %14 = vsyncpa [#allocation7], 0 }
   0x3   :  { %15 = vsyncpa [#allocation5], 0 }
   0x4   :  { %17 = vsyncpa [#allocation5 + $0x1], 0  ;;  %s3572_s21 = smov 0   ;;  %s3574_s22 = smov 0  }
   0x5   :  { %s3576_s23 = smov 0   ;;  %s3578_s24 = smov 0  }
   0x6   :  { %s3580_s25 = smov 0   ;;  %s3582_s26 = smov 0  }
   0x7 LB: > { %s2520_s27 = sadd.s32 4294967295, %s3524_s26   ;;  %s2521_s28 = sadd.s32 4294967294, %s3524_s26   ;;  %s3524_s26 = sphi %s3582_s26, %s23_s26   ;;  %s3520_s25 = sphi %s3580_s25, %s4219_s25   ;;  %s3516_s24 = sphi %s3578_s24, %s4218_s24   ;;  %s3512_s23 = sphi %s3576_s23, %s4217_s23   ;;  %s3508_s22 = sphi %s3574_s22, %s4216_s22   ;;  %s3504_s21 = sphi %s3572_s21, %s4215_s21  }
   0x8   : > { %p57_p0 = scmp.ne.s32.totalorder %s3508_s22, %s3504_s21  ;;  %p3606_p1 = scmp.eq.s32.totalorder %s2520_s27, 0 }
   0x9   : > { %p3610_p2 = scmp.eq.s32.totalorder %s2520_s27, 1  ;;  %p207_p3 = scmp.eq.s32.totalorder %s2521_s28, 1 }
   0xa   : > { %s4200_s29 = scalar_select %p3606_p1, 1, 0 }
   0xb   : > { %s4201_s30 = scalar_select %p3610_p2, 1, 0 }
   0xc   : > { %p3616_p4 = por %p3606_p1, %p57_p0  ;;  %p2522_p5 = scmp.ge.s32.totalorder %s3524_s26, 1 }
   0xd   : > { %p3621_p6 = por %p207_p3, %p57_p0  ;;  %p214_p7 = scmp.lt.s32.totalorder %s3524_s26, 3 }
   0xe   : > { %s4202_s7 = scalar_select %p3616_p4, 1, 0 }
   0xf   : > { %s4203_s8 = scalar_select %p3621_p6, 1, 0 }
  0x10   : > { %p3626_p8 = pnand %p2522_p5, %p214_p7  ;;  %s3526_s10 = smov [#allocation6]  }
  0x11   : > { %s235_s11 = sshll.u32 %s3526_s10, 4  ;;  %s35_s13 = sadd.s32 1, %s3520_s25  ;;  %s236_s11 = int_to_ptr.vmem [resolvable:$true] %s235_s11 }
  0x12   : > { %s4204_s9 = scalar_select %p3626_p8, 1, 0 }
  0x13   : > { %p3177_p9 = pneg %p3626_p8  ;;  %s3380_s16 = scalar_lea.hbm %s4193_s4, 4096 }
  0x14   : > { %p3381_p12 = scmp.ne.s32.totalorder %s4193_s4, %s3380_s16  ;;  %p3387_p5 = scmp.lt.u32.totalorder %s3380_s16, %s4193_s4 }
  0x15   : > { %p3635_p11 = pnand %p3177_p9, %p3606_p1 }
  0x17   : > { %p3382_p13 = pneg %p3635_p11 }
  0x19   : > { %p3383_p0 = pnand %p3382_p13, %p3381_p12 }
  0x1b   : > { %p3384_p3 = pneg %p3383_p0 }
  0x1d   : > { %p3389_p7 = pnand %p3387_p5, %p3384_p3 }
  0x1f   : > { %3392 = shalt.err (!%p3389_p7)
}
  0x20   : > { %s3393_s27 = scalar_lea.vmem %s236_s11, 4096  ;;  %p3401_p1 = scmp.lt.s32.totalorder %s236_s11, %s236_s11 }
  0x21   : > { %p3394_p9 = scmp.ne.s32.totalorder %s236_s11, %s3393_s27  ;;  %p3402_p4 = scmp.lt.s32.totalorder %s3393_s27, %s3393_s27 }
  0x23   : > { %p3396_p10 = pnand %p3394_p9, %p3382_p13  ;;  %p3403_p8 = por %p3402_p4, %p3401_p1 }
  0x25   : > { %p3397_p6 = pneg %p3396_p10 }
  0x27   : > { %p3404_p2 = pnand %p3403_p8, %p3397_p6 }
  0x29   : > { %3407 = shalt.err (!%p3404_p2)
}
  0x2a   : > { %s3527_s28 = smov 128   ;;  %s3528_s10 = smov 8  }
  0x2b   : > { %3180 = dma.hbm_to_vmem [thread:$0]  (!%p3635_p11), %s4193_s4, 4096, %s236_s11, [#allocation7], %s3527_s28, %s3527_s28, %s3528_s10  }
  0x2c   : > { %p37_p1 = scmp.ge.s32.totalorder %s35_s13, 2  ;;  %s44_s16 = sadd.s32 1, %s3512_s23 }
  0x2d   : > { %p51_p2 = scmp.ne.s32.totalorder %s3512_s23, %s3508_s22  ;;  %p52_p4 = scmp.eq.s32.totalorder %s3524_s26, 0 }
  0x2e   : > { %s4221_s13 = smov (%p37_p1, %s35_s13), 0  ;;  %p4207_p8 = scmp.ne.s32.totalorder %s4201_s30, 0 }
  0x2f   : > { %p3662_p6 = por %p52_p4, %p51_p2  ;;  %s39_s12 = ssub.s32 %s3520_s25, %s4221_s13 }
  0x30   : > { %p3668_p10 = por %p4207_p8, %p51_p2  ;;  %p3190_p12 = scmp.lt.s32.totalorder %s3524_s26, 2 }
  0x31   : > { %p42_p11 = scmp.eq.s32.totalorder %s39_s12, 0  ;;  %s252_s11 = sand.u32 1, %s3512_s23  }
  0x32   : > { %s2526_s19 = sshll.u32 %s252_s11, 9  ;;  %s2673_s27 = sshll.u32 %s3520_s25, 13 }
  0x33   : > { %s3677_s20 = scalar_select %p42_p11, %s3512_s23, %s44_s16  }
  0x34   : > { %s3683_s14 = scalar_lea.hbm %s4189_s0, %s2673_s27  ;;  %s256_s30 = scalar_lea.vmem [#allocation3], %s2526_s19 }
  0x35   : > { %s266_s15 = sshll.u32 %s256_s30, 4  ;;  %p3689_p13 = pnand %p3190_p12, %p3662_p6  ;;  %s3685_s15 = int_to_ptr.vmem [resolvable:$true] %s266_s15 }
  0x36   : > { %s3693_s16 = scalar_lea.sflag [#allocation4], %s252_s11  ;;  %s3408_s28 = scalar_lea.hbm %s3683_s14, 8192 }
  0x37   : > { %p3409_p0 = scmp.ne.s32.totalorder %s3683_s14, %s3408_s28  ;;  %p3410_p3 = pneg %p3689_p13 }
  0x38   : > { %s3413_s17 = scalar_lea.hbm %s4189_s0, 16384  ;;  %p3414_p9 = scmp.lt.u32.totalorder %s3683_s14, %s4189_s0 }
  0x39   : > { %p3411_p5 = pnand %p3410_p3, %p3409_p0  ;;  %p3415_p1 = scmp.lt.u32.totalorder %s3413_s17, %s3408_s28 }
  0x3a   : > { %p3417_p4 = scmp.lt.u32.totalorder %s3408_s28, %s3683_s14 }
  0x3b   : > { %p3412_p7 = pneg %p3411_p5  ;;  %p3416_p2 = por %p3415_p1, %p3414_p9 }
  0x3d   : > { %p3418_p6 = por %p3417_p4, %p3416_p2 }
  0x3f   : > { %p3419_p8 = pnand %p3418_p6, %p3412_p7 }
  0x41   : > { %3422 = shalt.err (!%p3419_p8)
}
  0x42   : > { %s3423_s11 = scalar_lea.vmem %s3685_s15, 8192  ;;  %s3529_s19 = smov [#allocation3]  }
  0x43   : > { %p3424_p12 = scmp.ne.s32.totalorder %s3685_s15, %s3423_s11  ;;  %s3428_s27 = sshll.u32 %s3529_s19, 4  ;;  %s3429_s27 = int_to_ptr.vmem [resolvable:$false] %s3428_s27 }
  0x44   : > { %s3430_s10 = scalar_lea.vmem %s3429_s27, 16384  ;;  %p3431_p5 = scmp.lt.s32.totalorder %s3685_s15, %s3429_s27 }
  0x45   : > { %p3426_p11 = pnand %p3424_p12, %p3410_p3  ;;  %p3432_p9 = scmp.lt.s32.totalorder %s3430_s10, %s3423_s11 }
  0x47   : > { %p3427_p0 = pneg %p3426_p11  ;;  %p3433_p1 = por %p3432_p9, %p3431_p5 }
  0x49   : > { %p3434_p2 = pnand %p3433_p1, %p3427_p0 }
  0x4b   : > { %3437 = shalt.err (!%p3434_p2)
}
  0x4c   : > { %s3530_s28 = smov 256   ;;  %s3531_s17 = smov 16  }
  0x4d   : > { %3184 = dma.hbm_to_vmem [thread:$0]  (!%p3689_p13), %s3683_s14, 8192, %s3685_s15, %s3693_s16, %s3530_s28, %s3530_s28, %s3531_s17  }
  0x4e   : > { %p4210_p3 = scmp.ne.s32.totalorder %s4204_s9, 0 }
  0x4f   : > { %s3724_s30 = sand.u32 (!%p4210_p3), 1, %s3508_s22   ;;  %p4211_p7 = scmp.ne.s32.totalorder (!%p4210_p3), %s4202_s7, 0 }
  0x50   : > { %296 = sbr.rel (%p4210_p3) target bundleno = 765 (0x2fd), region = 44  ;;  %s2531_s11 = sshll.u32 (!%p4210_p3), %s3724_s30, 9 }
  0x51   : > { %s299_s19 = scalar_lea.sflag (!%p4210_p3), [#allocation4], %s3724_s30  ;;  %s3728_s27 = scalar_lea.vmem (!%p4210_p3), [#allocation3], %s2531_s11 }
  0x57   : > { %3491 = dma.done.wait (%p4211_p7), %s299_s19, 8192  }
  0x58   : > { %3493 = vsyncadd (%p4211_p7), %s299_s19, 4294959104  ;;  %p4212_p13 = scmp.ne.s32.totalorder %s4200_s29, 0 }
  0x5a   : > { %3495 = dma.done.wait (%p4212_p13), [#allocation7], 4096  }
  0x5b   : > { %3497 = vsyncadd (%p4212_p13), [#allocation7], 4294963200  ;;  %v3532_v0 = vmov 0   ;;  %v3252_v1 = vld [vmem:[%s4191_s2 + $0x40] sm:$0xff]   ;;  %v3254_v3 = vld [vmem:[%s4191_s2 + $0x48] sm:$0xff]   ;;  %s2534_s29 = sshll.u32 %s3516_s24, 5 }
  0x5c   : > { %3250 = vset.pattern.permute.xlu0 %v3532_v0  ;;  %3251 = vset.pattern.permute.xlu1 %v3532_v0  ;;  %v3253_v2 = vld [vmem:[%s4191_s2] sm:$0xff]   ;;  %v3255_v4 = vld [vmem:[%s4191_s2 + $0x8] sm:$0xff]   ;;  %v3256_v5 = vld [vmem:[%s4191_s2 + $0x50] sm:$0xff]   ;;  %p353_p4 = scmp.lt.s32.totalorder %s2534_s29, 63  ;;  %s2533_s12 = sshll.u32 %s3724_s30, 7 }
  0x5d   : > { %3153 = vmatprep.subr.bf16.mxu1 %v3252_v1  ;;  %2881 = vmatprep.subr.bf16.mxu0 %v3252_v1  ;;  %v3257_v6 = vld [vmem:[%s4191_s2 + $0x10] sm:$0xff]   ;;  %v3258_v7 = vld [vmem:[%s4191_s2 + $0x58] sm:$0xff]   ;;  %v3260_v9 = vld [vmem:[%s4191_s2 + $0x60] sm:$0xff]   ;;  %s4085_s7 = scalar_lea.vmem [#allocation8], %s2533_s12  ;;  %s2706_s16 = sshll.u32 %s3516_s24, 11 }
  0x5e   : > { %3161 = vmatpush3.bf16.msra.mxu1 %v3253_v2  ;;  %2882 = vmatpush3.bf16.msra.mxu0 %v3253_v2  ;;  %v3259_v8 = vld [vmem:[%s4191_s2 + $0x18] sm:$0xff]   ;;  %v3261_v10 = vld [vmem:[%s4191_s2 + $0x20] sm:$0xff]   ;;  %v3262_v11 = vld [vmem:[%s4191_s2 + $0x68] sm:$0xff]   ;;  %s4223_s29 = smov (!%p353_p4, %s2534_s29), 63  ;;  %s2387_s10 = sshll.u32 %s4085_s7, 4  ;;  %s4139_s10 = int_to_ptr.vmem [resolvable:$true] %s2387_s10 }
  0x5f   : > { %3154 = vmatprep.subr.bf16.mxu1 %v3254_v3  ;;  %2883 = vmatprep.subr.bf16.mxu0 %v3254_v3  ;;  %v3270_v12 = vld [vmem:[%s3728_s27 + $0x104] ss:$16 sps:$4 sm:$0xff]   ;;  %v3263_v13 = vld [vmem:[%s4191_s2 + $0x28] sm:$0xff]   ;;  %v3266_v16 = vld [vmem:[%s4191_s2 + $0x78] sm:$0xff]   ;;  %s2535_s28 = sshll.u32 %s4223_s29, 3  ;;  %s2537_s19 = sshll.u32 %s4223_s29, 2 }
  0x60   : > { %1272 = vmatprep.mubr.bf16.mxu1 %v3270_v12  ;;  %v3264_v14 = vld [vmem:[%s4191_s2 + $0x70] sm:$0xff]   ;;  %v3267_v17 = vld [vmem:[%s4191_s2 + $0x38] sm:$0xff]   ;;  %v3271_v18 = vld [vmem:[%s4191_s2 + $0xc0] sm:$0xff]   ;;  %s3841_s14 = scalar_lea.vmem %s4190_s1, %s2535_s28  ;;  %s3952_s15 = scalar_lea.vmem %s4192_s3, %s2537_s19 }
  0x61   : > { %v3265_v15 = vld [vmem:[%s4191_s2 + $0x30] sm:$0xff]   ;;  %v3272_v20 = vld [vmem:[%s4191_s2 + $0x80] sm:$0xff]   ;;  %v3276_v22 = vld [vmem:[%s4191_s2 + $0xc8] sm:$0xff]   ;;  %s4137_s11 = scalar_lea.hbm %s4195_s6, %s2706_s16  ;;  %s2374_s19 = scalar_lea.sflag [#allocation5], %s3724_s30 }
  0x62   : > { %3162 = vmatpush3.bf16.msra.mxu1 %v3255_v4  ;;  %2884 = vmatpush3.bf16.msra.mxu0 %v3255_v4  ;;  %v3268_v19 = vld [vmem:[%s3728_s27 + $0x100] ss:$16 sps:$4 sm:$0xff]   ;;  %v3273_v21 = vld [vmem:[%s3728_s27 + $0x124] ss:$16 sps:$4 sm:$0xff]   ;;  %v3277_v23 = vld [vmem:[%s4191_s2 + $0x88] sm:$0xff]   ;;  %s3438_s9 = scalar_lea.vmem %s4139_s10, 2048 }
  0x63   : > { %3155 = vmatprep.subr.bf16.mxu1 %v3256_v5  ;;  %2885 = vmatprep.subr.bf16.mxu0 %v3256_v5  ;;  %v3281_v24 = vld [vmem:[%s4191_s2 + $0xd0] sm:$0xff]   ;;  %v3286_v28 = vld [vmem:[%s4191_s2 + $0xd8] sm:$0xff]   ;;  %v3291_v32 = vld [vmem:[%s4191_s2 + $0xe0] sm:$0xff]   ;;  %p3439_p6 = scmp.ne.s32.totalorder %s4139_s10, %s3438_s9  ;;  %s3534_s24 = smov [#allocation8]  }
  0x64   : > { %v3275_v25 = vld [vmem:[%s3728_s27 + $0x120] ss:$16 sps:$4 sm:$0xff]   ;;  %v3278_v26 = vld [vmem:[%s3728_s27 + $0x144] ss:$16 sps:$4 sm:$0xff]   ;;  %v3287_v29 = vld [vmem:[%s4191_s2 + $0x98] sm:$0xff]  }
  0x65   : > { %v3282_v27 = vld [vmem:[%s4191_s2 + $0x90] sm:$0xff]   ;;  %v3292_v36 = vld [vmem:[%s4191_s2 + $0xa0] sm:$0xff]   ;;  %v3296_v37 = vld [vmem:[%s4191_s2 + $0xe8] sm:$0xff]   ;;  %p3440_p8 = pnand %p3439_p6, %p3668_p10 }
  0x66   : > { %3163 = vmatpush3.bf16.msra.mxu1 %v3257_v6  ;;  %2886 = vmatpush3.bf16.msra.mxu0 %v3257_v6  ;;  %v3308_v30 = vld [vmem:[%s3728_s27] ss:$16 sps:$4 sm:$0xff]   ;;  %v3310_v31 = vld [vmem:[%s3728_s27 + $0x4] ss:$16 sps:$4 sm:$0xff]   ;;  %v3297_v39 = vld [vmem:[%s4191_s2 + $0xa8] sm:$0xff]  }
  0x67   : > { %3156 = vmatprep.subr.bf16.mxu1 %v3258_v7  ;;  %2887 = vmatprep.subr.bf16.mxu0 %v3258_v7  ;;  %v3280_v33 = vld [vmem:[%s3728_s27 + $0x140] ss:$16 sps:$4 sm:$0xff]   ;;  %v3314_v34 = vld [vmem:[%s3728_s27 + $0x24] ss:$16 sps:$4 sm:$0xff]   ;;  %v3306_v46 = vld [vmem:[%s4191_s2 + $0xf8] sm:$0xff]   ;;  %p3441_p12 = pneg %p3440_p8 }
  0x68   : > { %1208 = vmatprep.mubr.bf16.mxu0 %v3310_v31  ;;  %v3283_v35 = vld [vmem:[%s3728_s27 + $0x164] ss:$16 sps:$4 sm:$0xff]   ;;  %v3316_v38 = vld [vmem:[%s3728_s27 + $0x20] ss:$16 sps:$4 sm:$0xff]   ;;  %v1598_v47 = vld [vmem:[%s3841_s14 + $0x8] sm:$0xff] }
  0x69   : > { %v3320_v40 = vld [vmem:[%s3728_s27 + $0x44] ss:$16 sps:$4 sm:$0xff]   ;;  %v3285_v42 = vld [vmem:[%s3728_s27 + $0x160] ss:$16 sps:$4 sm:$0xff]   ;;  %v3307_v50 = vld [vmem:[%s4191_s2 + $0xb8] sm:$0xff]  }
  0x6a   : > { %3164 = vmatpush3.bf16.msra.mxu1 %v3259_v8  ;;  %2888 = vmatpush3.bf16.msra.mxu0 %v3259_v8  ;;  %v3301_v41 = vld [vmem:[%s4191_s2 + $0xf0] sm:$0xff]   ;;  %v1597_v44 = vld [vmem:[%s3841_s14] sm:$0xff]  ;;  %v1600_v52 = vld [vmem:[%s3841_s14 + $0x18] sm:$0xff] }
  0x6b   : > { %3157 = vmatprep.subr.bf16.mxu1 %v3260_v9  ;;  %2889 = vmatprep.subr.bf16.mxu0 %v3260_v9  ;;  %v3288_v43 = vld [vmem:[%s3728_s27 + $0x184] ss:$16 sps:$4 sm:$0xff]   ;;  %v3322_v49 = vld [vmem:[%s3728_s27 + $0x40] ss:$16 sps:$4 sm:$0xff]   ;;  %v1602_v56 = vld [vmem:[%s3841_s14 + $0x28] sm:$0xff] }
  0x6c   : > { %v3302_v45 = vld [vmem:[%s4191_s2 + $0xb0] sm:$0xff]   ;;  %1631 = vperm.xlu0 %3250, %v1597_v44   ;;  %v1601_v53 = vld [vmem:[%s3841_s14 + $0x20] sm:$0xff]  ;;  %v1604_v60 = vld [vmem:[%s3841_s14 + $0x38] sm:$0xff] }
  0x6d   : > { %v1599_v48 = vld [vmem:[%s3841_s14 + $0x10] sm:$0xff]  ;;  %v1605_v61 = vld [vmem:[%s3841_s14 + $0x40] sm:$0xff]  ;;  %v1606_v0 = vld [vmem:[%s3841_s14 + $0x48] sm:$0xff] }
  0x6e   : > { %3165 = vmatpush3.bf16.msra.mxu1 %v3261_v10  ;;  %2890 = vmatpush3.bf16.msra.mxu0 %v3261_v10  ;;  %v3326_v51 = vld [vmem:[%s3728_s27 + $0x64] ss:$16 sps:$4 sm:$0xff]   ;;  %v3290_v54 = vld [vmem:[%s3728_s27 + $0x180] ss:$16 sps:$4 sm:$0xff]   ;;  %v1608_v4 = vld [vmem:[%s3841_s14 + $0x58] sm:$0xff] }
  0x6f   : > { %3158 = vmatprep.subr.bf16.mxu1 %v3262_v11  ;;  %2891 = vmatprep.subr.bf16.mxu0 %v3262_v11  ;;  %v3293_v55 = vld [vmem:[%s3728_s27 + $0x1a4] ss:$16 sps:$4 sm:$0xff]   ;;  %v3328_v58 = vld [vmem:[%s3728_s27 + $0x60] ss:$16 sps:$4 sm:$0xff]   ;;  %v1610_v8 = vld [vmem:[%s3841_s14 + $0x68] sm:$0xff] }
  0x70   : > { %1641 = vperm.xlu1 %3251, %v1599_v48   ;;  %1636 = vperm.xlu0 %3250, %v1598_v47   ;;  %v1603_v57 = vld [vmem:[%s3841_s14 + $0x30] sm:$0xff]  ;;  %v1609_v5 = vld [vmem:[%s3841_s14 + $0x60] sm:$0xff]  ;;  %v1612_v12 = vld [vmem:[%s3841_s14 + $0x78] sm:$0xff] }
  0x71   : > { %v3332_v59 = vld [vmem:[%s3728_s27 + $0x84] ss:$16 sps:$4 sm:$0xff]   ;;  %v3295_v62 = vld [vmem:[%s3728_s27 + $0x1a0] ss:$16 sps:$4 sm:$0xff]   ;;  %v1622_v31 = vld [vmem:[%s3841_s14 + $0xc8] sm:$0xff] }
  0x72   : > { %3166 = vmatpush3.bf16.msra.mxu1 %v3263_v13  ;;  %2892 = vmatpush3.bf16.msra.mxu0 %v3263_v13  ;;  %v3298_v63 = vld [vmem:[%s3728_s27 + $0x1c4] ss:$16 sps:$4 sm:$0xff]   ;;  %v3334_v2 = vld [vmem:[%s3728_s27 + $0x80] ss:$16 sps:$4 sm:$0xff]   ;;  %v3341_v47 = vld [vmem:[%s3728_s27 + $0xac] ss:$16 sps:$4 sm:$0xff]  }
  0x73   : > { %3159 = vmatprep.subr.bf16.mxu1 %v3264_v14  ;;  %2893 = vmatprep.subr.bf16.mxu0 %v3264_v14  ;;  %v1607_v1 = vld [vmem:[%s3841_s14 + $0x50] sm:$0xff]  ;;  %v1613_v13 = vld [vmem:[%s3841_s14 + $0x80] sm:$0xff] }
  0x74   : > { %1646 = vperm.xlu1 %3251, %v1600_v52   ;;  %1651 = vperm.xlu0 %3250, %v1601_v53   ;;  %v3338_v3 = vld [vmem:[%s3728_s27 + $0xa4] ss:$16 sps:$4 sm:$0xff]   ;;  %v3300_v6 = vld [vmem:[%s3728_s27 + $0x1c0] ss:$16 sps:$4 sm:$0xff]   ;;  %v1922_v52 = vld [vmem:[#allocation6 + $0x28] sm:$0xff] }
  0x75   : > { %v3303_v7 = vld [vmem:[%s3728_s27 + $0x1e4] ss:$16 sps:$4 sm:$0xff]   ;;  %v3340_v10 = vld [vmem:[%s3728_s27 + $0xa0] ss:$16 sps:$4 sm:$0xff]  }
  0x76   : > { %3167 = vmatpush3.bf16.msra.mxu1 %v3265_v15  ;;  %2894 = vmatpush3.bf16.msra.mxu0 %v3265_v15  ;;  %v1611_v9 = vld [vmem:[%s3841_s14 + $0x70] sm:$0xff]  ;;  %v3313_v15 = vld [vmem:[%s3728_s27 + $0xc] ss:$16 sps:$4 sm:$0xff]  }
  0x77   : > { %3160 = vmatprep.subr.bf16.mxu1 %v3266_v16  ;;  %2895 = vmatprep.subr.bf16.mxu0 %v3266_v16  ;;  %v3344_v11 = vld [vmem:[%s3728_s27 + $0xc4] ss:$16 sps:$4 sm:$0xff]   ;;  %v3305_v14 = vld [vmem:[%s3728_s27 + $0x1e0] ss:$16 sps:$4 sm:$0xff]   ;;  %v1614_v16 = vld [vmem:[%s3841_s14 + $0x88] sm:$0xff] }
  0x78   : > { %1656 = vperm.xlu1 %3251, %v1602_v56   ;;  %1661 = vperm.xlu0 %3250, %v1603_v57   ;;  %v1919_v48 = vld [vmem:[#allocation6 + $0x10] sm:$0xff]  ;;  %v1924_v57 = vld [vmem:[#allocation6 + $0x38] sm:$0xff] }
  0x79   : > { %v1923_v56 = vld [vmem:[#allocation6 + $0x30] sm:$0xff] }
  0x7a   : > { %3168 = vmatpush3.bf16.msra.mxu1 %v3267_v17  ;;  %2896 = vmatpush3.bf16.msra.mxu0 %v3267_v17  ;;  %v1615_v17 = vld [vmem:[%s3841_s14 + $0x90] sm:$0xff] }
  0x7b   : > { %2993 = vmatprep.subr.bf16.mxu1 %v3271_v18  ;;  %v3346_v18 = vld [vmem:[%s3728_s27 + $0xc0] ss:$16 sps:$4 sm:$0xff]  }
  0x7c   : > { %1666 = vperm.xlu1 %3251, %v1604_v60   ;;  %1671 = vperm.xlu0 %3250, %v1605_v61   ;;  %v1926_v60 = vld [vmem:[#allocation6 + $0x48] sm:$0xff] }
  0x7d   : > { %1273 = vmatmul.mubr.bf16.vlgmr.msra.gmra.mrb[0].mxu1 %v3268_v19  ;;  %1209 = vmatmul.mubr.bf16.vlgmr.msra.gmra.mrb[0].mxu0 %v3308_v30  ;;  %v3350_v19 = vld [vmem:[%s3728_s27 + $0xe4] ss:$16 sps:$4 sm:$0xff]   ;;  %v3323_v30 = vld [vmem:[%s3728_s27 + $0x4c] ss:$16 sps:$4 sm:$0xff]  }
  0x7e   : > { %2994 = vmatpush3.bf16.msra.mxu1 %v3272_v20  ;;  %1280 = vmatprep.mubr.bf16.mxu1 %v3273_v21  ;;  %v1616_v20 = vld [vmem:[%s3841_s14 + $0x98] sm:$0xff]  ;;  %v1617_v21 = vld [vmem:[%s3841_s14 + $0xa0] sm:$0xff] }
  0x7f   : > { %2995 = vmatprep.subr.bf16.mxu1 %v3276_v22  ;;  %1216 = vmatprep.mubr.bf16.mxu0 %v3314_v34  ;;  %v3311_v22 = vld [vmem:[%s3728_s27 + $0x8] ss:$16 sps:$4 sm:$0xff]   ;;  %v1625_v34 = vld [vmem:[%s3841_s14 + $0xe0] sm:$0xff] }
  0x80   : > { %1676 = vperm.xlu1 %3251, %v1606_v0   ;;  %1681 = vperm.xlu0 %3250, %v1607_v1   ;;  %v1927_v0 = vld [vmem:[#allocation6 + $0x50] sm:$0xff]  ;;  %v1928_v1 = vld [vmem:[#allocation6 + $0x58] sm:$0xff] }
  0x82   : > { %2996 = vmatpush3.bf16.msra.mxu1 %v3277_v23  ;;  %v3317_v23 = vld [vmem:[%s3728_s27 + $0x2c] ss:$16 sps:$4 sm:$0xff]  }
  0x83   : > { %2997 = vmatprep.subr.bf16.mxu1 %v3281_v24  ;;  %v1618_v24 = vld [vmem:[%s3841_s14 + $0xa8] sm:$0xff] }
  0x84   : > { %1686 = vperm.xlu1 %3251, %v1608_v4   ;;  %1691 = vperm.xlu0 %3250, %v1609_v5   ;;  %v1930_v4 = vld [vmem:[#allocation6 + $0x68] sm:$0xff] }
  0x85   : > { %1281 = vmatmul.mubr.bf16.gmra.mrb[4].mxu1 %v3275_v25  ;;  %1217 = vmatmul.mubr.bf16.gmra.mrb[4].mxu0 %v3316_v38  ;;  %v1619_v25 = vld [vmem:[%s3841_s14 + $0xb0] sm:$0xff] }
  0x86   : > { %1288 = vmatprep.mubr.bf16.mxu1 %v3278_v26  ;;  %2998 = vmatpush3.bf16.msra.mxu1 %v3282_v27  ;;  %v3352_v26 = vld [vmem:[%s3728_s27 + $0xe0] ss:$16 sps:$4 sm:$0xff]   ;;  %v1620_v27 = vld [vmem:[%s3841_s14 + $0xb8] sm:$0xff] }
  0x87   : > { %2999 = vmatprep.subr.bf16.mxu1 %v3286_v28  ;;  %1224 = vmatprep.mubr.bf16.mxu0 %v3320_v40  ;;  %v1621_v28 = vld [vmem:[%s3841_s14 + $0xc0] sm:$0xff]  ;;  %v1627_v38 = vld [vmem:[%s3841_s14 + $0xf0] sm:$0xff]  ;;  %v3331_v40 = vld [vmem:[%s3728_s27 + $0x68] ss:$16 sps:$4 sm:$0xff]  }
  0x88   : > { %1696 = vperm.xlu1 %3251, %v1610_v8   ;;  %1701 = vperm.xlu0 %3250, %v1611_v9   ;;  %v1931_v8 = vld [vmem:[#allocation6 + $0x70] sm:$0xff]  ;;  %v1932_v9 = vld [vmem:[#allocation6 + $0x78] sm:$0xff] }
  0x8a   : > { %3000 = vmatpush3.bf16.msra.mxu1 %v3287_v29  ;;  %v3319_v29 = vld [vmem:[%s3728_s27 + $0x28] ss:$16 sps:$4 sm:$0xff]  }
  0x8b   : > { %3001 = vmatprep.subr.bf16.mxu1 %v3291_v32  ;;  %v1623_v32 = vld [vmem:[%s3841_s14 + $0xd0] sm:$0xff] }
  0x8c   : > { %1706 = vperm.xlu1 %3251, %v1612_v12   ;;  %1711 = vperm.xlu0 %3250, %v1613_v13   ;;  %v1934_v12 = vld [vmem:[#allocation6 + $0x88] sm:$0xff] }
  0x8d   : > { %1289 = vmatmul.mubr.bf16.gmra.mrb[8].mxu1 %v3280_v33  ;;  %1225 = vmatmul.mubr.bf16.gmra.mrb[8].mxu0 %v3322_v49  ;;  %v1624_v33 = vld [vmem:[%s3841_s14 + $0xd8] sm:$0xff] }
  0x8e   : > { %1296 = vmatprep.mubr.bf16.mxu1 %v3283_v35  ;;  %3002 = vmatpush3.bf16.msra.mxu1 %v3292_v36  ;;  %v3325_v35 = vld [vmem:[%s3728_s27 + $0x48] ss:$16 sps:$4 sm:$0xff]   ;;  %v3329_v36 = vld [vmem:[%s3728_s27 + $0x6c] ss:$16 sps:$4 sm:$0xff]  }
  0x8f   : > { %3003 = vmatprep.subr.bf16.mxu1 %v3296_v37  ;;  %1232 = vmatprep.mubr.bf16.mxu0 %v3326_v51  ;;  %v1626_v37 = vld [vmem:[%s3841_s14 + $0xe8] sm:$0xff]  ;;  %v1920_v49 = vld [vmem:[#allocation6 + $0x18] sm:$0xff]  ;;  %v1921_v51 = vld [vmem:[#allocation6 + $0x20] sm:$0xff] }
  0x90   : > { %1716 = vperm.xlu1 %3251, %v1614_v16   ;;  %1721 = vperm.xlu0 %3250, %v1615_v17   ;;  %v3112_v53 = vpack.c.bf16 %v1922_v52, %v1921_v51  ;;  %v1935_v16 = vld [vmem:[#allocation6 + $0x90] sm:$0xff]  ;;  %v1936_v17 = vld [vmem:[#allocation6 + $0x98] sm:$0xff] }
  0x91   : > { %v3379_v51 = vld [vmem:[%s3728_s27 + $0x1e8] ss:$16 sps:$4 sm:$0xff]  }
  0x92   : > { %3004 = vmatpush3.bf16.msra.mxu1 %v3297_v39  ;;  %v1628_v39 = vld [vmem:[%s3841_s14 + $0xf8] sm:$0xff]  ;;  %s3442_s14 = sshll.u32 %s3534_s24, 4  ;;  %s3443_s14 = int_to_ptr.vmem [resolvable:$false] %s3442_s14 }
  0x93   : > { %3005 = vmatprep.subr.bf16.mxu1 %v3301_v41  ;;  %v3335_v41 = vld [vmem:[%s3728_s27 + $0x8c] ss:$16 sps:$4 sm:$0xff]   ;;  %p3445_p11 = scmp.lt.s32.totalorder %s4139_s10, %s3443_s14 }
  0x94   : > { %1726 = vperm.xlu1 %3251, %v1616_v20   ;;  %1731 = vperm.xlu0 %3250, %v1617_v21   ;;  %v1938_v20 = vld [vmem:[#allocation6 + $0xa8] sm:$0xff] }
  0x95   : > { %1297 = vmatmul.mubr.bf16.gmra.mrb[12].mxu1 %v3285_v42  ;;  %1233 = vmatmul.mubr.bf16.gmra.mrb[12].mxu0 %v3328_v58  ;;  %v1917_v42 = vld [vmem:[#allocation6] sm:$0xff]  ;;  %v3115_v58 = vpack.c.bf16 %v1924_v57, %v1923_v56 }
  0x96   : > { %1304 = vmatprep.mubr.bf16.mxu1 %v3288_v43  ;;  %3006 = vmatpush3.bf16.msra.mxu1 %v3302_v45  ;;  %v1918_v43 = vld [vmem:[#allocation6 + $0x8] sm:$0xff]  ;;  %v3533_v45 = vmov 0.0|0.0  }
  0x97   : > { %3007 = vmatprep.subr.bf16.mxu1 %v3306_v46  ;;  %1240 = vmatprep.mubr.bf16.mxu0 %v3332_v59  ;;  %v3106_v44 = vpack.c.bf16 %v1918_v43, %v1917_v42  ;;  %v3337_v46 = vld [vmem:[%s3728_s27 + $0x88] ss:$16 sps:$4 sm:$0xff]   ;;  %v1925_v59 = vld [vmem:[#allocation6 + $0x40] sm:$0xff] }
  0x98   : > { %1736 = vperm.xlu1 %3251, %v1618_v24   ;;  %1741 = vperm.xlu0 %3250, %v1619_v25   ;;  %v3118_v61 = vpack.c.bf16 %v1926_v60, %v1925_v59  ;;  %v1939_v24 = vld [vmem:[#allocation6 + $0xb0] sm:$0xff]  ;;  %v1940_v25 = vld [vmem:[#allocation6 + $0xb8] sm:$0xff]  ;;  %v3955_v43 = vld [vmem:[%s3952_s15] sm:$0xff]  }
  0x99   : > { %3105 = vmatprep.subr.bf16.mxu0 %v3533_v45 }
  0x9a   : > { %3008 = vmatpush3.bf16.msra.mxu1 %v3307_v50  ;;  %3107 = vmatpush1.bf16.msra.mxu0 %v3106_v44  ;;  %v3109_v50 = vpack.c.bf16 %v1920_v49, %v1919_v48  ;;  %v2709_v44 = vunpack.c.l.bf16 %v3955_v43  ;;  %v3374_v48 = vld [vmem:[%s3728_s27 + $0x1cc] ss:$16 sps:$4 sm:$0xff]   ;;  %v3376_v49 = vld [vmem:[%s3728_s27 + $0x1c8] ss:$16 sps:$4 sm:$0xff]  }
  0x9b   : > { %3108 = vmatprep.subr.bf16.mxu0 %v3533_v45 }
  0x9c   : > { %1746 = vperm.xlu1 %3251, %v1620_v27   ;;  %1751 = vperm.xlu0 %3250, %v1621_v28   ;;  %v1941_v27 = vld [vmem:[#allocation6 + $0xc0] sm:$0xff]  ;;  %v1942_v28 = vld [vmem:[#allocation6 + $0xc8] sm:$0xff] }
  0x9d   : > { %1305 = vmatmul.mubr.bf16.gmra.mrb[16].mxu1 %v3290_v54  ;;  %1241 = vmatmul.mubr.bf16.gmra.mrb[16].mxu0 %v3334_v2  ;;  %v3343_v54 = vld [vmem:[%s3728_s27 + $0xa8] ss:$16 sps:$4 sm:$0xff]   ;;  %v3121_v2 = vpack.c.bf16 %v1928_v1, %v1927_v0 }
  0x9e   : > { %1312 = vmatprep.mubr.bf16.mxu1 %v3293_v55  ;;  %1248 = vmatprep.mubr.bf16.mxu0 %v3338_v3  ;;  %v3347_v55 = vld [vmem:[%s3728_s27 + $0xcc] ss:$16 sps:$4 sm:$0xff]   ;;  %v1929_v3 = vld [vmem:[#allocation6 + $0x60] sm:$0xff] }
  0x9f   : > { %3110 = vmatpush1.bf16.msra.mxu0 %v3109_v50  ;;  %v3124_v5 = vpack.c.bf16 %v1930_v4, %v1929_v3  ;;  %v3377_v50 = vld [vmem:[%s3728_s27 + $0x1ec] ss:$16 sps:$4 sm:$0xff]  }
  0xa0   : > { %1756 = vperm.xlu1 %3251, %v1622_v31   ;;  %1761 = vperm.xlu0 %3250, %v1623_v32   ;;  %v3365_v31 = vld [vmem:[%s3728_s27 + $0x16c] ss:$16 sps:$4 sm:$0xff]   ;;  %v1943_v32 = vld [vmem:[#allocation6 + $0xd0] sm:$0xff] }
  0xa1   : > { %3111 = vmatprep.subr.bf16.mxu0 %v3533_v45 }
  0xa3   : > { %3113 = vmatpush1.bf16.msra.mxu0 %v3112_v53 }
  0xa4   : > { %1766 = vperm.xlu1 %3251, %v1624_v33   ;;  %1771 = vperm.xlu0 %3250, %v1625_v34   ;;  %v1944_v33 = vld [vmem:[#allocation6 + $0xd8] sm:$0xff] }
  0xa5   : > { %1313 = vmatmul.mubr.bf16.gmra.mrb[20].mxu1 %v3295_v62  ;;  %1249 = vmatmul.mubr.bf16.gmra.mrb[20].mxu0 %v3340_v10  ;;  %v3349_v62 = vld [vmem:[%s3728_s27 + $0xc8] ss:$16 sps:$4 sm:$0xff]   ;;  %v3127_v10 = vpack.c.bf16 %v1932_v9, %v1931_v8  ;;  %v3145_v34 = vpack.c.bf16 %v1944_v33, %v1943_v32 }
  0xa6   : > { %1320 = vmatprep.mubr.bf16.mxu1 %v3298_v63  ;;  %1256 = vmatprep.mubr.bf16.mxu0 %v3344_v11  ;;  %v3353_v63 = vld [vmem:[%s3728_s27 + $0xec] ss:$16 sps:$4 sm:$0xff]   ;;  %v1933_v11 = vld [vmem:[#allocation6 + $0x80] sm:$0xff] }
  0xa7   : > { %3114 = vmatprep.subr.bf16.mxu0 %v3533_v45  ;;  %v3130_v13 = vpack.c.bf16 %v1934_v12, %v1933_v11 }
  0xa8   : > { %1776 = vperm.xlu1 %3251, %v1626_v37   ;;  %1781 = vperm.xlu0 %3250, %v1627_v38   ;;  %v3367_v38 = vld [vmem:[%s3728_s27 + $0x168] ss:$16 sps:$4 sm:$0xff]  }
  0xa9   : > { %3116 = vmatpush1.bf16.msra.mxu0 %v3115_v58 }
  0xaa   : > { %3117 = vmatprep.subr.bf16.mxu0 %v3533_v45 }
  0xac   : > { %1786 = vperm.xlu1 %3251, %v1628_v39   ;;  %v3368_v39 = vld [vmem:[%s3728_s27 + $0x18c] ss:$16 sps:$4 sm:$0xff]  }
  0xad   : > { %1321 = vmatmul.mubr.bf16.gmra.mrb[24].mxu1 %v3300_v6  ;;  %1257 = vmatmul.mubr.bf16.gmra.mrb[24].mxu0 %v3346_v18  ;;  %v3355_v6 = vld [vmem:[%s3728_s27 + $0xe8] ss:$16 sps:$4 sm:$0xff]   ;;  %v3133_v18 = vpack.c.bf16 %v1936_v17, %v1935_v16 }
  0xae   : > { %1328 = vmatprep.mubr.bf16.mxu1 %v3303_v7  ;;  %1264 = vmatprep.mubr.bf16.mxu0 %v3350_v19  ;;  %v3356_v7 = vld [vmem:[%s3728_s27 + $0x10c] ss:$16 sps:$4 sm:$0xff]   ;;  %v1937_v19 = vld [vmem:[#allocation6 + $0xa0] sm:$0xff] }
  0xaf   : > { %3119 = vmatpush1.bf16.msra.mxu0 %v3118_v61  ;;  %v3136_v21 = vpack.c.bf16 %v1938_v20, %v1937_v19 }
  0xb0   : > { %3120 = vmatprep.subr.bf16.mxu0 %v3533_v45 }
  0xb3   : > { %3122 = vmatpush1.bf16.msra.mxu0 %v3121_v2 }
  0xb4   : > { %3123 = vmatprep.subr.bf16.mxu0 %v3533_v45 }
  0xb5   : > { %1329 = vmatmul.mubr.bf16.gmra.mrb[28].mxu1 %v3305_v14  ;;  %1265 = vmatmul.mubr.bf16.gmra.mrb[28].mxu0 %v3352_v26  ;;  %v3358_v14 = vld [vmem:[%s3728_s27 + $0x108] ss:$16 sps:$4 sm:$0xff]   ;;  %v3139_v26 = vpack.c.bf16 %v1940_v25, %v1939_v24 }
  0xb6   : > { %1369 = vmatprep.mubr.bf16.mxu1 %v3313_v15  ;;  %v3359_v15 = vld [vmem:[%s3728_s27 + $0x12c] ss:$16 sps:$4 sm:$0xff]   ;;  %2020 = vmatprep.mubr.f32.mxu0 %v2709_v44 }
  0xb7   : > { %3125 = vmatpush1.bf16.msra.mxu0 %v3124_v5 }
  0xb8   : > { %3126 = vmatprep.subr.bf16.mxu0 %v3533_v45 }
  0xbb   : > { %3128 = vmatpush1.bf16.msra.mxu0 %v3127_v10 }
  0xbc   : > { %3129 = vmatprep.subr.bf16.mxu0 %v3533_v45 }
  0xbd   : > { %1370 = vmatmul.mubr.bf16.vlgmr.msra.gmra.mrb[32].mxu1 %v3311_v22  ;;  %v3361_v22 = vld [vmem:[%s3728_s27 + $0x128] ss:$16 sps:$4 sm:$0xff]  }
  0xbe   : > { %1377 = vmatprep.mubr.bf16.mxu1 %v3317_v23  ;;  %v3362_v23 = vld [vmem:[%s3728_s27 + $0x14c] ss:$16 sps:$4 sm:$0xff]  }
  0xbf   : > { %3131 = vmatpush1.bf16.msra.mxu0 %v3130_v13 }
  0xc0   : > { %3132 = vmatprep.subr.bf16.mxu0 %v3533_v45 }
  0xc3   : > { %3134 = vmatpush1.bf16.msra.mxu0 %v3133_v18 }
  0xc4   : > { %3135 = vmatprep.subr.bf16.mxu0 %v3533_v45 }
  0xc5   : > { %1378 = vmatmul.mubr.bf16.gmra.mrb[36].mxu1 %v3319_v29  ;;  %v3142_v29 = vpack.c.bf16 %v1942_v28, %v1941_v27 }
  0xc6   : > { %1385 = vmatprep.mubr.bf16.mxu1 %v3323_v30  ;;  %v3364_v30 = vld [vmem:[%s3728_s27 + $0x148] ss:$16 sps:$4 sm:$0xff]  }
  0xc7   : > { %3137 = vmatpush1.bf16.msra.mxu0 %v3136_v21 }
  0xc8   : > { %3138 = vmatprep.subr.bf16.mxu0 %v3533_v45 }
  0xcb   : > { %3140 = vmatpush1.bf16.msra.mxu0 %v3139_v26 }
  0xcc   : > { %3141 = vmatprep.subr.bf16.mxu0 %v3533_v45 }
  0xcd   : > { %1386 = vmatmul.mubr.bf16.gmra.mrb[40].mxu1 %v3325_v35  ;;  %v1945_v35 = vld [vmem:[#allocation6 + $0xe0] sm:$0xff] }
  0xce   : > { %1393 = vmatprep.mubr.bf16.mxu1 %v3329_v36  ;;  %v1946_v36 = vld [vmem:[#allocation6 + $0xe8] sm:$0xff] }
  0xcf   : > { %3143 = vmatpush1.bf16.msra.mxu0 %v3142_v29  ;;  %v3148_v37 = vpack.c.bf16 %v1946_v36, %v1945_v35 }
  0xd0   : > { %3144 = vmatprep.subr.bf16.mxu0 %v3533_v45 }
  0xd3   : > { %3146 = vmatpush1.bf16.msra.mxu0 %v3145_v34 }
  0xd4   : > { %3147 = vmatprep.subr.bf16.mxu0 %v3533_v45 }
  0xd5   : > { %1394 = vmatmul.mubr.bf16.gmra.mrb[44].mxu1 %v3331_v40  ;;  %v1947_v40 = vld [vmem:[#allocation6 + $0xf0] sm:$0xff] }
  0xd6   : > { %1401 = vmatprep.mubr.bf16.mxu1 %v3335_v41  ;;  %v1948_v41 = vld [vmem:[#allocation6 + $0xf8] sm:$0xff] }
  0xd7   : > { %3149 = vmatpush1.bf16.msra.mxu0 %v3148_v37  ;;  %v3151_v42 = vpack.c.bf16 %v1948_v41, %v1947_v40 }
  0xd8   : > { %3150 = vmatprep.subr.bf16.mxu0 %v3533_v45  ;;  %v3370_v45 = vld [vmem:[%s3728_s27 + $0x188] ss:$16 sps:$4 sm:$0xff]  }
  0xdb   : > { %3152 = vmatpush1.bf16.msra.mxu0 %v3151_v42 }
  0xdd   : > { %1402 = vmatmul.mubr.bf16.gmra.mrb[48].mxu1 %v3337_v46  ;;  %v3371_v46 = vld [vmem:[%s3728_s27 + $0x1ac] ss:$16 sps:$4 sm:$0xff]  }
  0xde   : > { %1409 = vmatprep.mubr.bf16.mxu1 %v3341_v47  ;;  %v3373_v47 = vld [vmem:[%s3728_s27 + $0x1a8] ss:$16 sps:$4 sm:$0xff]  }
  0xe5   : > { %1410 = vmatmul.mubr.bf16.gmra.mrb[52].mxu1 %v3343_v54 }
  0xe6   : > { %1417 = vmatprep.mubr.bf16.mxu1 %v3347_v55 }
  0xed   : > { %1418 = vmatmul.mubr.bf16.gmra.mrb[56].mxu1 %v3349_v62 }
  0xee   : > { %1425 = vmatprep.mubr.bf16.mxu1 %v3353_v63 }
  0xf5   : > { %1426 = vmatmul.mubr.bf16.gmra.mrb[60].mxu1 %v3355_v6 }
  0xf6   : > { %1433 = vmatprep.mubr.bf16.mxu1 %v3356_v7 }
  0xfd   : > { %1434 = vmatmul.mubr.bf16.gmra.mrb[64].mxu1 %v3358_v14 }
  0xfe   : > { %1441 = vmatprep.mubr.bf16.mxu1 %v3359_v15 }
 0x105   : > { %1442 = vmatmul.mubr.bf16.gmra.mrb[68].mxu1 %v3361_v22 }
 0x106   : > { %1449 = vmatprep.mubr.bf16.mxu1 %v3362_v23 }
 0x10d   : > { %1450 = vmatmul.mubr.bf16.gmra.mrb[72].mxu1 %v3364_v30 }
 0x10e   : > { %1457 = vmatprep.mubr.bf16.mxu1 %v3365_v31 }
 0x115   : > { %1458 = vmatmul.mubr.bf16.gmra.mrb[76].mxu1 %v3367_v38 }
 0x116   : > { %1465 = vmatprep.mubr.bf16.mxu1 %v3368_v39 }
 0x11d   : > { %1466 = vmatmul.mubr.bf16.gmra.mrb[80].mxu1 %v3370_v45 }
 0x11e   : > { %1473 = vmatprep.mubr.bf16.mxu1 %v3371_v46 }
 0x125   : > { %1474 = vmatmul.mubr.bf16.gmra.mrb[84].mxu1 %v3373_v47 }
 0x126   : > { %1481 = vmatprep.mubr.bf16.mxu1 %v3374_v48 }
 0x12d   : > { %1482 = vmatmul.mubr.bf16.gmra.mrb[88].mxu1 %v3376_v49 }
 0x12e   : > { %1489 = vmatprep.mubr.bf16.mxu1 %v3377_v50 }
 0x135   : > { %1490 = vmatmul.mubr.bf16.gmra.mrb[92].mxu1 %v3379_v51 }
 0x150   : > { %v2945_v52 = vpop.f32.mrb[0].mxu1  ;;  %v2897_v0 = vpop.f32.mrb[0].mxu0 }
 0x151   : > { %v2946_v53 = vpop.f32.mrb[1].mxu1  ;;  %v2898_v1 = vpop.f32.mrb[1].mxu0 }
 0x152   : > { %v3965_v54 = vadd.f32 %v2946_v53, %v2945_v52  ;;  %v2948_v55 = vpop.f32.mrb[2].mxu1  ;;  %v3973_v2 = vadd.f32 %v2898_v1, %v2897_v0  ;;  %v2900_v3 = vpop.f32.mrb[2].mxu0 }
 0x153   : > { %v2949_v56 = vpop.f32.mrb[3].mxu1  ;;  %v2901_v4 = vpop.f32.mrb[3].mxu0 }
 0x154   : > { %v3967_v57 = vadd.f32 %v2949_v56, %v2948_v55  ;;  %v3975_v6 = vadd.f32 %v2901_v4, %v2900_v3 }
 0x158   : > { %v2951_v58 = vpop.f32.mrb[4].mxu1  ;;  %v2903_v12 = vpop.f32.mrb[4].mxu0 }
 0x159   : > { %v2952_v59 = vpop.f32.mrb[5].mxu1  ;;  %v2904_v13 = vpop.f32.mrb[5].mxu0 }
 0x15a   : > { %v3969_v60 = vadd.f32 %v2952_v59, %v2951_v58  ;;  %v2954_v61 = vpop.f32.mrb[6].mxu1  ;;  %v3981_v14 = vadd.f32 %v2904_v13, %v2903_v12  ;;  %v2906_v15 = vpop.f32.mrb[6].mxu0 }
 0x15b   : > { %v2955_v62 = vpop.f32.mrb[7].mxu1  ;;  %v2907_v16 = vpop.f32.mrb[7].mxu0 }
 0x15c   : > { %v3971_v63 = vadd.f32 %v2955_v62, %v2954_v61  ;;  %v3983_v18 = vadd.f32 %v2907_v16, %v2906_v15 }
 0x160   : > { %v2957_v5 = vpop.f32.mrb[8].mxu1  ;;  %v2909_v24 = vpop.f32.mrb[8].mxu0 }
 0x161   : > { %v2958_v7 = vpop.f32.mrb[9].mxu1  ;;  %v2910_v25 = vpop.f32.mrb[9].mxu0 }
 0x162   : > { %v3977_v8 = vadd.f32 %v2958_v7, %v2957_v5  ;;  %v2960_v9 = vpop.f32.mrb[10].mxu1  ;;  %v3989_v26 = vadd.f32 %v2910_v25, %v2909_v24  ;;  %v2912_v27 = vpop.f32.mrb[10].mxu0 }
 0x163   : > { %v2961_v10 = vpop.f32.mrb[11].mxu1  ;;  %v2913_v28 = vpop.f32.mrb[11].mxu0 }
 0x164   : > { %v3979_v11 = vadd.f32 %v2961_v10, %v2960_v9  ;;  %v3991_v30 = vadd.f32 %v2913_v28, %v2912_v27 }
 0x168   : > { %v2963_v17 = vpop.f32.mrb[12].mxu1  ;;  %v2915_v36 = vpop.f32.mrb[12].mxu0 }
 0x169   : > { %v2964_v19 = vpop.f32.mrb[13].mxu1  ;;  %v2916_v37 = vpop.f32.mrb[13].mxu0 }
 0x16a   : > { %v3985_v20 = vadd.f32 %v2964_v19, %v2963_v17  ;;  %v2966_v21 = vpop.f32.mrb[14].mxu1  ;;  %v3997_v38 = vadd.f32 %v2916_v37, %v2915_v36  ;;  %v2918_v39 = vpop.f32.mrb[14].mxu0 }
 0x16b   : > { %v2967_v22 = vpop.f32.mrb[15].mxu1  ;;  %v2919_v40 = vpop.f32.mrb[15].mxu0 }
 0x16c   : > { %v3987_v23 = vadd.f32 %v2967_v22, %v2966_v21  ;;  %v3999_v42 = vadd.f32 %v2919_v40, %v2918_v39 }
 0x170   : > { %v2969_v29 = vpop.f32.mrb[16].mxu1  ;;  %v2921_v49 = vpop.f32.mrb[16].mxu0 }
 0x171   : > { %v2970_v31 = vpop.f32.mrb[17].mxu1  ;;  %v2922_v50 = vpop.f32.mrb[17].mxu0 }
 0x172   : > { %v3993_v32 = vadd.f32 %v2970_v31, %v2969_v29  ;;  %v2972_v33 = vpop.f32.mrb[18].mxu1  ;;  %v4005_v51 = vadd.f32 %v2922_v50, %v2921_v49  ;;  %v2924_v52 = vpop.f32.mrb[18].mxu0  ;;  %v2851_v49 = vld [vmem:[%s3952_s15 + $0x8] sm:$0xff]  }
 0x173   : > { %v2973_v34 = vpop.f32.mrb[19].mxu1  ;;  %v2925_v53 = vpop.f32.mrb[19].mxu0 }
 0x174   : > { %v3995_v35 = vadd.f32 %v2973_v34, %v2972_v33  ;;  %v4007_v56 = vadd.f32 %v2925_v53, %v2924_v52  ;;  %v1632_v34 = vpop.permute.xlu0 %1631 }
 0x178   : > { %v2975_v41 = vpop.f32.mrb[20].mxu1  ;;  %v2927_v1 = vpop.f32.mrb[20].mxu0 }
 0x179   : > { %v2976_v44 = vpop.f32.mrb[21].mxu1  ;;  %v2928_v3 = vpop.f32.mrb[21].mxu0 }
 0x17a   : > { %v4001_v45 = vadd.f32 %v2976_v44, %v2975_v41  ;;  %v2978_v46 = vpop.f32.mrb[22].mxu1  ;;  %v4013_v4 = vadd.f32 %v2928_v3, %v2927_v1  ;;  %v2930_v5 = vpop.f32.mrb[22].mxu0  ;;  %v2710_v41 = vunpack.c.h.bf16 %v3955_v43 }
 0x17b   : > { %v2979_v47 = vpop.f32.mrb[23].mxu1  ;;  %v2931_v7 = vpop.f32.mrb[23].mxu0 }
 0x17c   : > { %v4003_v48 = vadd.f32 %v2979_v47, %v2978_v46  ;;  %v4015_v10 = vadd.f32 %v2931_v7, %v2930_v5  ;;  %v1642_v5 = vpop.permute.xlu1 %1641 }
 0x180   : > { %v2981_v55 = vpop.f32.mrb[24].mxu1  ;;  %v2933_v19 = vpop.f32.mrb[24].mxu0 }
 0x181   : > { %v2982_v58 = vpop.f32.mrb[25].mxu1  ;;  %v2934_v21 = vpop.f32.mrb[25].mxu0 }
 0x182   : > { %v4009_v59 = vadd.f32 %v2982_v58, %v2981_v55  ;;  %v2984_v61 = vpop.f32.mrb[26].mxu1  ;;  %v4021_v22 = vadd.f32 %v2934_v21, %v2933_v19  ;;  %v2936_v24 = vpop.f32.mrb[26].mxu0  ;;  %v2852_v19 = vld [vmem:[%s3952_s15 + $0x10] sm:$0xff]  }
 0x183   : > { %v2985_v62 = vpop.f32.mrb[27].mxu1  ;;  %v2937_v25 = vpop.f32.mrb[27].mxu0 }
 0x184   : > { %v4011_v0 = vadd.f32 %v2985_v62, %v2984_v61  ;;  %v4023_v28 = vadd.f32 %v2937_v25, %v2936_v24  ;;  %v1637_v61 = vpop.permute.xlu0 %1636  ;;  %v2713_v62 = vunpack.c.l.bf16 %v2851_v49  ;;  %v1647_v24 = vpop.permute.xlu1 %1646 }
 0x188   : > { %v2987_v9 = vpop.f32.mrb[28].mxu1  ;;  %v2939_v40 = vpop.f32.mrb[28].mxu0 }
 0x189   : > { %v2988_v12 = vpop.f32.mrb[29].mxu1  ;;  %v2940_v44 = vpop.f32.mrb[29].mxu0 }
 0x18a   : > { %v4017_v13 = vadd.f32 %v2988_v12, %v2987_v9  ;;  %v2990_v15 = vpop.f32.mrb[30].mxu1  ;;  %v4029_v50 = vadd.f32 %v2940_v44, %v2939_v40  ;;  %v2942_v52 = vpop.f32.mrb[30].mxu0  ;;  %v2714_v12 = vunpack.c.h.bf16 %v2851_v49 }
 0x18b   : > { %v2991_v16 = vpop.f32.mrb[31].mxu1  ;;  %v2943_v53 = vpop.f32.mrb[31].mxu0 }
 0x18c   : > { %v4019_v17 = vadd.f32 %v2991_v16, %v2990_v15  ;;  %v4031_v58 = vadd.f32 %v2943_v53, %v2942_v52 }
 0x190   : > { %v3009_v27 = vpop.f32.mrb[32].mxu1 }
 0x191   : > { %v3010_v29 = vpop.f32.mrb[33].mxu1 }
 0x192   : > { %v3011_v31 = vadd.f32 %v3010_v29, %v3009_v27  ;;  %v3012_v33 = vpop.f32.mrb[34].mxu1  ;;  %v2717_v27 = vunpack.c.l.bf16 %v2852_v19 }
 0x193   : > { %v3013_v36 = vpop.f32.mrb[35].mxu1 }
 0x194   : > { %v1372_v37 = vadd.f32 %v3011_v31, %v3973_v2  ;;  %v3014_v39 = vadd.f32 %v3013_v36, %v3012_v33 }
 0x196   : > { %v1789_v46 = vmul.f32 %v1632_v34, %v1372_v37  ;;  %v1375_v47 = vadd.f32 %v3014_v39, %v3975_v6  ;;  %v1652_v37 = vpop.permute.xlu0 %1651 }
 0x198   : > { %v3015_v55 = vpop.f32.mrb[36].mxu1  ;;  %2021 = vmatmul.mubr.f32.vlgmr.msra.gmra.mrb[32].mxu0 %v1789_v46  ;;  %v1790_v3 = vmul.f32 %v1637_v61, %v1375_v47  ;;  %v1657_v46 = vpop.permute.xlu1 %1656 }
 0x199   : > { %v3016_v2 = vpop.f32.mrb[37].mxu1  ;;  %2025 = vmatprep.mubr.f32.mxu0 %v2710_v41  ;;  %v2853_v41 = vld [vmem:[%s3952_s15 + $0x18] sm:$0xff]  }
 0x19a   : > { %v3017_v1 = vadd.f32 %v3016_v2, %v3015_v55  ;;  %v3018_v43 = vpop.f32.mrb[38].mxu1  ;;  %v2721_v49 = vunpack.c.l.bf16 %v2853_v41 }
 0x19b   : > { %v3019_v7 = vpop.f32.mrb[39].mxu1 }
 0x19c   : > { %v1380_v6 = vadd.f32 %v3017_v1, %v3981_v14  ;;  %v3020_v9 = vadd.f32 %v3019_v7, %v3018_v43  ;;  %2026 = vmatmul.mubr.f32.gmra.mrb[34].mxu0 %v1790_v3  ;;  %v2854_v3 = vld [vmem:[%s3952_s15 + $0x20] sm:$0xff]   ;;  %v1667_v7 = vpop.permute.xlu1 %1666 }
 0x19d   : > { %2030 = vmatprep.mubr.f32.mxu0 %v2713_v62  ;;  %v1662_v62 = vpop.permute.xlu0 %1661 }
 0x19e   : > { %v1383_v15 = vadd.f32 %v3020_v9, %v3983_v18  ;;  %v1791_v16 = vmul.f32 %v1642_v5, %v1380_v6  ;;  %v2718_v18 = vunpack.c.h.bf16 %v2852_v19  ;;  %v2725_v9 = vunpack.c.l.bf16 %v2854_v3 }
 0x1a0   : > { %v3021_v21 = vpop.f32.mrb[40].mxu1  ;;  %2031 = vmatmul.mubr.f32.gmra.mrb[36].mxu0 %v1791_v16  ;;  %v1792_v33 = vmul.f32 %v1647_v24, %v1383_v15 }
 0x1a1   : > { %v3022_v25 = vpop.f32.mrb[41].mxu1  ;;  %2035 = vmatprep.mubr.f32.mxu0 %v2714_v12  ;;  %v1672_v24 = vpop.permute.xlu0 %1671 }
 0x1a2   : > { %v3023_v29 = vadd.f32 %v3022_v25, %v3021_v21  ;;  %v3024_v31 = vpop.f32.mrb[42].mxu1 }
 0x1a3   : > { %v3025_v34 = vpop.f32.mrb[43].mxu1 }
 0x1a4   : > { %v1388_v14 = vadd.f32 %v3023_v29, %v3989_v26  ;;  %v3026_v36 = vadd.f32 %v3025_v34, %v3024_v31  ;;  %2036 = vmatmul.mubr.f32.gmra.mrb[38].mxu0 %v1792_v33  ;;  %v2855_v29 = vld [vmem:[%s3952_s15 + $0x28] sm:$0xff]   ;;  %v1677_v33 = vpop.permute.xlu1 %1676 }
 0x1a5   : > { %2040 = vmatprep.mubr.f32.mxu0 %v2717_v27 }
 0x1a6   : > { %v1391_v39 = vadd.f32 %v3026_v36, %v3991_v30  ;;  %v1793_v40 = vmul.f32 %v1652_v37, %v1388_v14  ;;  %v2722_v30 = vunpack.c.h.bf16 %v2853_v41  ;;  %v2729_v14 = vunpack.c.l.bf16 %v2855_v29  ;;  %v1682_v41 = vpop.permute.xlu0 %1681 }
 0x1a8   : > { %v3027_v44 = vpop.f32.mrb[44].mxu1  ;;  %2041 = vmatmul.mubr.f32.gmra.mrb[40].mxu0 %v1793_v40  ;;  %v1794_v55 = vmul.f32 %v1657_v46, %v1391_v39 }
 0x1a9   : > { %v3028_v47 = vpop.f32.mrb[45].mxu1  ;;  %2045 = vmatprep.mubr.f32.mxu0 %v2718_v18 }
 0x1aa   : > { %v3029_v52 = vadd.f32 %v3028_v47, %v3027_v44  ;;  %v3030_v53 = vpop.f32.mrb[46].mxu1  ;;  %v2856_v47 = vld [vmem:[%s3952_s15 + $0x30] sm:$0xff]  }
 0x1ab   : > { %v3031_v26 = vpop.f32.mrb[47].mxu1 }
 0x1ac   : > { %v1396_v61 = vadd.f32 %v3029_v52, %v3997_v38  ;;  %v3032_v2 = vadd.f32 %v3031_v26, %v3030_v53  ;;  %2046 = vmatmul.mubr.f32.gmra.mrb[42].mxu0 %v1794_v55  ;;  %v1687_v52 = vpop.permute.xlu1 %1686  ;;  %v2733_v55 = vunpack.c.l.bf16 %v2856_v47 }
 0x1ad   : > { %2050 = vmatprep.mubr.f32.mxu0 %v2721_v49 }
 0x1ae   : > { %v1399_v1 = vadd.f32 %v3032_v2, %v3999_v42  ;;  %v1795_v43 = vmul.f32 %v1662_v62, %v1396_v61  ;;  %v2726_v42 = vunpack.c.h.bf16 %v2854_v3 }
 0x1b0   : > { %v3033_v5 = vpop.f32.mrb[48].mxu1  ;;  %2051 = vmatmul.mubr.f32.gmra.mrb[44].mxu0 %v1795_v43  ;;  %v1796_v16 = vmul.f32 %v1667_v7, %v1399_v1  ;;  %v1692_v1 = vpop.permute.xlu0 %1691 }
 0x1b1   : > { %v3034_v6 = vpop.f32.mrb[49].mxu1  ;;  %2055 = vmatprep.mubr.f32.mxu0 %v2722_v30 }
 0x1b2   : > { %v3035_v12 = vadd.f32 %v3034_v6, %v3033_v5  ;;  %v3036_v15 = vpop.f32.mrb[50].mxu1  ;;  %v2857_v5 = vld [vmem:[%s3952_s15 + $0x38] sm:$0xff]   ;;  %v1697_v6 = vpop.permute.xlu1 %1696 }
 0x1b3   : > { %v3037_v38 = vpop.f32.mrb[51].mxu1 }
 0x1b4   : > { %v1404_v19 = vadd.f32 %v3035_v12, %v4005_v51  ;;  %v3038_v21 = vadd.f32 %v3037_v38, %v3036_v15  ;;  %2056 = vmatmul.mubr.f32.gmra.mrb[46].mxu0 %v1796_v16  ;;  %v2737_v12 = vunpack.c.l.bf16 %v2857_v5 }
 0x1b5   : > { %2060 = vmatprep.mubr.f32.mxu0 %v2725_v9 }
 0x1b6   : > { %v1407_v25 = vadd.f32 %v3038_v21, %v4007_v56  ;;  %v1797_v27 = vmul.f32 %v1672_v24, %v1404_v19  ;;  %v2730_v56 = vunpack.c.h.bf16 %v2855_v29  ;;  %v1702_v24 = vpop.permute.xlu0 %1701 }
 0x1b8   : > { %v3039_v31 = vpop.f32.mrb[52].mxu1  ;;  %2061 = vmatmul.mubr.f32.gmra.mrb[48].mxu0 %v1797_v27  ;;  %v1798_v18 = vmul.f32 %v1677_v33, %v1407_v25  ;;  %v2858_v27 = vld [vmem:[%s3952_s15 + $0x40] sm:$0xff]  }
 0x1b9   : > { %v3040_v34 = vpop.f32.mrb[53].mxu1  ;;  %2065 = vmatprep.mubr.f32.mxu0 %v2726_v42 }
 0x1ba   : > { %v3041_v36 = vadd.f32 %v3040_v34, %v3039_v31  ;;  %v3042_v37 = vpop.f32.mrb[54].mxu1  ;;  %v1707_v31 = vpop.permute.xlu1 %1706  ;;  %v2741_v34 = vunpack.c.l.bf16 %v2858_v27 }
 0x1bb   : > { %v3043_v51 = vpop.f32.mrb[55].mxu1 }
 0x1bc   : > { %v1412_v39 = vadd.f32 %v3041_v36, %v4013_v4  ;;  %v3044_v40 = vadd.f32 %v3043_v51, %v3042_v37  ;;  %2066 = vmatmul.mubr.f32.gmra.mrb[50].mxu0 %v1798_v18 }
 0x1bd   : > { %2070 = vmatprep.mubr.f32.mxu0 %v2729_v14 }
 0x1be   : > { %v1415_v44 = vadd.f32 %v3044_v40, %v4015_v10  ;;  %v1799_v46 = vmul.f32 %v1682_v41, %v1412_v39  ;;  %v2734_v10 = vunpack.c.h.bf16 %v2856_v47  ;;  %v1712_v39 = vpop.permute.xlu0 %1711 }
 0x1c0   : > { %v3045_v49 = vpop.f32.mrb[56].mxu1  ;;  %2071 = vmatmul.mubr.f32.gmra.mrb[52].mxu0 %v1799_v46  ;;  %v1800_v2 = vmul.f32 %v1687_v52, %v1415_v44  ;;  %v1717_v46 = vpop.permute.xlu1 %1716 }
 0x1c1   : > { %v3046_v53 = vpop.f32.mrb[57].mxu1  ;;  %2075 = vmatprep.mubr.f32.mxu0 %v2730_v56  ;;  %v2859_v56 = vld [vmem:[%s3952_s15 + $0x48] sm:$0xff]  }
 0x1c2   : > { %v3047_v26 = vadd.f32 %v3046_v53, %v3045_v49  ;;  %v3048_v61 = vpop.f32.mrb[58].mxu1  ;;  %v2745_v49 = vunpack.c.l.bf16 %v2859_v56 }
 0x1c3   : > { %v3049_v4 = vpop.f32.mrb[59].mxu1 }
 0x1c4   : > { %v1420_v62 = vadd.f32 %v3047_v26, %v4021_v22  ;;  %v3050_v30 = vadd.f32 %v3049_v4, %v3048_v61  ;;  %2076 = vmatmul.mubr.f32.gmra.mrb[54].mxu0 %v1800_v2  ;;  %v1722_v2 = vpop.permute.xlu0 %1721 }
 0x1c5   : > { %2080 = vmatprep.mubr.f32.mxu0 %v2733_v55 }
 0x1c6   : > { %v1423_v43 = vadd.f32 %v3050_v30, %v4023_v28  ;;  %v1801_v3 = vmul.f32 %v1692_v1, %v1420_v62  ;;  %v2738_v28 = vunpack.c.h.bf16 %v2857_v5  ;;  %v2860_v30 = vld [vmem:[%s3952_s15 + $0x50] sm:$0xff]  }
 0x1c8   : > { %v3051_v7 = vpop.f32.mrb[60].mxu1  ;;  %2081 = vmatmul.mubr.f32.gmra.mrb[56].mxu0 %v1801_v3  ;;  %v1802_v38 = vmul.f32 %v1697_v6, %v1423_v43  ;;  %v2749_v3 = vunpack.c.l.bf16 %v2860_v30 }
 0x1c9   : > { %v3052_v9 = vpop.f32.mrb[61].mxu1  ;;  %2085 = vmatprep.mubr.f32.mxu0 %v2734_v10  ;;  %v1727_v10 = vpop.permute.xlu1 %1726 }
 0x1ca   : > { %v3053_v15 = vadd.f32 %v3052_v9, %v3051_v7  ;;  %v3054_v16 = vpop.f32.mrb[62].mxu1 }
 0x1cb   : > { %v3055_v22 = vpop.f32.mrb[63].mxu1 }
 0x1cc   : > { %v1428_v19 = vadd.f32 %v3053_v15, %v4029_v50  ;;  %v3056_v21 = vadd.f32 %v3055_v22, %v3054_v16  ;;  %2086 = vmatmul.mubr.f32.gmra.mrb[58].mxu0 %v1802_v38  ;;  %v1732_v15 = vpop.permute.xlu0 %1731  ;;  %v2861_v22 = vld [vmem:[%s3952_s15 + $0x58] sm:$0xff]  }
 0x1cd   : > { %2090 = vmatprep.mubr.f32.mxu0 %v2737_v12 }
 0x1ce   : > { %v1431_v42 = vadd.f32 %v3056_v21, %v4031_v58  ;;  %v1803_v25 = vmul.f32 %v1702_v24, %v1428_v19  ;;  %v2742_v58 = vunpack.c.h.bf16 %v2858_v27  ;;  %v1737_v21 = vpop.permute.xlu1 %1736 }
 0x1d0   : > { %v3057_v29 = vpop.f32.mrb[64].mxu1  ;;  %2091 = vmatmul.mubr.f32.gmra.mrb[60].mxu0 %v1803_v25  ;;  %v1804_v37 = vmul.f32 %v1707_v31, %v1431_v42 }
 0x1d1   : > { %v3058_v33 = vpop.f32.mrb[65].mxu1  ;;  %2095 = vmatprep.mubr.f32.mxu0 %v2738_v28  ;;  %v2753_v28 = vunpack.c.l.bf16 %v2861_v22 }
 0x1d2   : > { %v3059_v14 = vadd.f32 %v3058_v33, %v3057_v29  ;;  %v3060_v36 = vpop.f32.mrb[66].mxu1  ;;  %v1742_v33 = vpop.permute.xlu0 %1741 }
 0x1d3   : > { %v3061_v50 = vpop.f32.mrb[67].mxu1 }
 0x1d4   : > { %v1436_v18 = vadd.f32 %v3059_v14, %v3965_v54  ;;  %v3062_v51 = vadd.f32 %v3061_v50, %v3060_v36  ;;  %2096 = vmatmul.mubr.f32.gmra.mrb[62].mxu0 %v1804_v37  ;;  %v2862_v36 = vld [vmem:[%s3952_s15 + $0x60] sm:$0xff]   ;;  %v1747_v50 = vpop.permute.xlu1 %1746 }
 0x1d5   : > { %2100 = vmatprep.mubr.f32.mxu0 %v2741_v34 }
 0x1d6   : > { %v1439_v40 = vadd.f32 %v3062_v51, %v3967_v57  ;;  %v1805_v41 = vmul.f32 %v1712_v39, %v1436_v18  ;;  %v2746_v57 = vunpack.c.h.bf16 %v2859_v56  ;;  %v2757_v51 = vunpack.c.l.bf16 %v2862_v36 }
 0x1d8   : > { %v3063_v44 = vpop.f32.mrb[68].mxu1  ;;  %2101 = vmatmul.mubr.f32.gmra.mrb[64].mxu0 %v1805_v41  ;;  %v1806_v55 = vmul.f32 %v1717_v46, %v1439_v40 }
 0x1d9   : > { %v3064_v47 = vpop.f32.mrb[69].mxu1  ;;  %2105 = vmatprep.mubr.f32.mxu0 %v2742_v58 }
 0x1da   : > { %v3065_v52 = vadd.f32 %v3064_v47, %v3063_v44  ;;  %v3066_v53 = vpop.f32.mrb[70].mxu1  ;;  %v1752_v44 = vpop.permute.xlu0 %1751 }
 0x1db   : > { %v3067_v54 = vpop.f32.mrb[71].mxu1 }
 0x1dc   : > { %v1444_v26 = vadd.f32 %v3065_v52, %v3969_v60  ;;  %v3068_v61 = vadd.f32 %v3067_v54, %v3066_v53  ;;  %2106 = vmatmul.mubr.f32.gmra.mrb[66].mxu0 %v1806_v55  ;;  %v1757_v53 = vpop.permute.xlu1 %1756 }
 0x1dd   : > { %2110 = vmatprep.mubr.f32.mxu0 %v2745_v49  ;;  %v2863_v49 = vld [vmem:[%s3952_s15 + $0x68] sm:$0xff]  }
 0x1de   : > { %v1447_v4 = vadd.f32 %v3068_v61, %v3971_v63  ;;  %v1807_v62 = vmul.f32 %v1722_v2, %v1444_v26  ;;  %v2750_v63 = vunpack.c.h.bf16 %v2860_v30  ;;  %v2761_v54 = vunpack.c.l.bf16 %v2863_v49 }
 0x1e0   : > { %v3069_v1 = vpop.f32.mrb[72].mxu1  ;;  %2111 = vmatmul.mubr.f32.gmra.mrb[68].mxu0 %v1807_v62  ;;  %v1808_v6 = vmul.f32 %v1727_v10, %v1447_v4  ;;  %v1762_v62 = vpop.permute.xlu0 %1761  ;;  %v2864_v10 = vld [vmem:[%s3952_s15 + $0x70] sm:$0xff]  }
 0x1e1   : > { %v3070_v43 = vpop.f32.mrb[73].mxu1  ;;  %2115 = vmatprep.mubr.f32.mxu0 %v2746_v57 }
 0x1e2   : > { %v3071_v5 = vadd.f32 %v3070_v43, %v3069_v1  ;;  %v3072_v7 = vpop.f32.mrb[74].mxu1 }
 0x1e3   : > { %v3073_v60 = vpop.f32.mrb[75].mxu1 }
 0x1e4   : > { %v1452_v9 = vadd.f32 %v3071_v5, %v3977_v8  ;;  %v3074_v12 = vadd.f32 %v3073_v60, %v3072_v7  ;;  %2116 = vmatmul.mubr.f32.gmra.mrb[70].mxu0 %v1808_v6  ;;  %v2765_v7 = vunpack.c.l.bf16 %v2864_v10 }
 0x1e5   : > { %2120 = vmatprep.mubr.f32.mxu0 %v2749_v3  ;;  %v1767_v3 = vpop.permute.xlu1 %1766 }
 0x1e6   : > { %v1455_v16 = vadd.f32 %v3074_v12, %v3979_v11  ;;  %v1809_v38 = vmul.f32 %v1732_v15, %v1452_v9  ;;  %v2754_v11 = vunpack.c.h.bf16 %v2861_v22  ;;  %v2865_v22 = vld [vmem:[%s3952_s15 + $0x78] sm:$0xff]   ;;  %s3444_s15 = scalar_lea.vmem %s3443_s14, 4096 }
 0x1e7   : > { %p3446_p0 = scmp.lt.s32.totalorder %s3444_s15, %s3438_s9 }
 0x1e8   : > { %v3075_v19 = vpop.f32.mrb[76].mxu1  ;;  %2121 = vmatmul.mubr.f32.gmra.mrb[72].mxu0 %v1809_v38  ;;  %v1810_v27 = vmul.f32 %v1737_v21, %v1455_v16 }
 0x1e9   : > { %v3076_v24 = vpop.f32.mrb[77].mxu1  ;;  %2125 = vmatprep.mubr.f32.mxu0 %v2750_v63  ;;  %v1772_v63 = vpop.permute.xlu0 %1771  ;;  %p3447_p5 = por %p3446_p0, %p3445_p11 }
 0x1ea   : > { %v3077_v42 = vadd.f32 %v3076_v24, %v3075_v19  ;;  %v3078_v25 = vpop.f32.mrb[78].mxu1  ;;  %v1777_v21 = vpop.permute.xlu1 %1776 }
 0x1eb   : > { %v3079_v8 = vpop.f32.mrb[79].mxu1  ;;  %p3448_p9 = pnand %p3447_p5, %p3441_p12 }
 0x1ec   : > { %v1460_v29 = vadd.f32 %v3077_v42, %v3985_v20  ;;  %v3080_v31 = vadd.f32 %v3079_v8, %v3078_v25  ;;  %2126 = vmatmul.mubr.f32.gmra.mrb[74].mxu0 %v1810_v27 }
 0x1ed   : > { %2130 = vmatprep.mubr.f32.mxu0 %v2753_v28  ;;  %v2769_v28 = vunpack.c.l.bf16 %v2865_v22 }
 0x1ee   : > { %v1463_v34 = vadd.f32 %v3080_v31, %v3987_v23  ;;  %v1811_v14 = vmul.f32 %v1742_v33, %v1460_v29  ;;  %v2758_v23 = vunpack.c.h.bf16 %v2862_v36  ;;  %v1782_v31 = vpop.permute.xlu0 %1781  ;;  %v4080_v36 = vld [vmem:[%s4194_s5] ss:$0 sm:$0xff] }
 0x1f0   : > { %v3081_v37 = vpop.f32.mrb[80].mxu1  ;;  %2131 = vmatmul.mubr.f32.gmra.mrb[76].mxu0 %v1811_v14  ;;  %v1812_v40 = vmul.f32 %v1747_v50, %v1463_v34  ;;  %v1787_v34 = vpop.permute.xlu1 %1786 }
 0x1f1   : > { %v3082_v18 = vpop.f32.mrb[81].mxu1  ;;  %2135 = vmatprep.mubr.f32.mxu0 %v2754_v11 }
 0x1f2   : > { %v3083_v39 = vadd.f32 %v3082_v18, %v3081_v37  ;;  %v3084_v58 = vpop.f32.mrb[82].mxu1 }
 0x1f3   : > { %v3085_v20 = vpop.f32.mrb[83].mxu1 }
 0x1f4   : > { %v1468_v41 = vadd.f32 %v3083_v39, %v3993_v32  ;;  %v3086_v56 = vadd.f32 %v3085_v20, %v3084_v58  ;;  %2136 = vmatmul.mubr.f32.gmra.mrb[78].mxu0 %v1812_v40 }
 0x1f5   : > { %2140 = vmatprep.mubr.f32.mxu0 %v2757_v51 }
 0x1f6   : > { %v1471_v46 = vadd.f32 %v3086_v56, %v3995_v35  ;;  %v1813_v47 = vmul.f32 %v1752_v44, %v1468_v41  ;;  %v2762_v35 = vunpack.c.h.bf16 %v2863_v49 }
 0x1f8   : > { %v3087_v52 = vpop.f32.mrb[84].mxu1  ;;  %2141 = vmatmul.mubr.f32.gmra.mrb[80].mxu0 %v1813_v47  ;;  %v1814_v2 = vmul.f32 %v1757_v53, %v1471_v46 }
 0x1f9   : > { %v3088_v55 = vpop.f32.mrb[85].mxu1  ;;  %2145 = vmatprep.mubr.f32.mxu0 %v2758_v23 }
 0x1fa   : > { %v3089_v26 = vadd.f32 %v3088_v55, %v3087_v52  ;;  %v3090_v61 = vpop.f32.mrb[86].mxu1 }
 0x1fb   : > { %v3091_v32 = vpop.f32.mrb[87].mxu1 }
 0x1fc   : > { %v1476_v57 = vadd.f32 %v3089_v26, %v4001_v45  ;;  %v3092_v4 = vadd.f32 %v3091_v32, %v3090_v61  ;;  %2146 = vmatmul.mubr.f32.gmra.mrb[82].mxu0 %v1814_v2 }
 0x1fd   : > { %2150 = vmatprep.mubr.f32.mxu0 %v2761_v54 }
 0x1fe   : > { %v1479_v30 = vadd.f32 %v3092_v4, %v4003_v48  ;;  %v1815_v1 = vmul.f32 %v1762_v62, %v1476_v57  ;;  %v2766_v48 = vunpack.c.h.bf16 %v2864_v10 }
 0x200   : > { %v3093_v43 = vpop.f32.mrb[88].mxu1  ;;  %2151 = vmatmul.mubr.f32.gmra.mrb[84].mxu0 %v1815_v1  ;;  %v1816_v9 = vmul.f32 %v1767_v3, %v1479_v30 }
 0x201   : > { %v3094_v5 = vpop.f32.mrb[89].mxu1  ;;  %2155 = vmatprep.mubr.f32.mxu0 %v2762_v35 }
 0x202   : > { %v3095_v6 = vadd.f32 %v3094_v5, %v3093_v43  ;;  %v3096_v60 = vpop.f32.mrb[90].mxu1 }
 0x203   : > { %v3097_v45 = vpop.f32.mrb[91].mxu1 }
 0x204   : > { %v1484_v12 = vadd.f32 %v3095_v6, %v4009_v59  ;;  %v3098_v15 = vadd.f32 %v3097_v45, %v3096_v60  ;;  %2156 = vmatmul.mubr.f32.gmra.mrb[86].mxu0 %v1816_v9 }
 0x205   : > { %2160 = vmatprep.mubr.f32.mxu0 %v2765_v7 }
 0x206   : > { %v1487_v16 = vadd.f32 %v3098_v15, %v4011_v0  ;;  %v1817_v38 = vmul.f32 %v1772_v63, %v1484_v12  ;;  %v2770_v0 = vunpack.c.h.bf16 %v2865_v22 }
 0x208   : > { %v3099_v19 = vpop.f32.mrb[92].mxu1  ;;  %2161 = vmatmul.mubr.f32.gmra.mrb[88].mxu0 %v1817_v38  ;;  %v1818_v27 = vmul.f32 %v1777_v21, %v1487_v16 }
 0x209   : > { %v3100_v24 = vpop.f32.mrb[93].mxu1  ;;  %2165 = vmatprep.mubr.f32.mxu0 %v2766_v48 }
 0x20a   : > { %v3101_v42 = vadd.f32 %v3100_v24, %v3099_v19  ;;  %v3102_v25 = vpop.f32.mrb[94].mxu1 }
 0x20b   : > { %v3103_v8 = vpop.f32.mrb[95].mxu1 }
 0x20c   : > { %v1492_v59 = vadd.f32 %v3101_v42, %v4017_v13  ;;  %v3104_v29 = vadd.f32 %v3103_v8, %v3102_v25  ;;  %2166 = vmatmul.mubr.f32.gmra.mrb[90].mxu0 %v1818_v27 }
 0x20d   : > { %2170 = vmatprep.mubr.f32.mxu0 %v2769_v28 }
 0x20e   : > { %v1495_v33 = vadd.f32 %v3104_v29, %v4019_v17  ;;  %v1819_v11 = vmul.f32 %v1782_v31, %v1492_v59 }
 0x210   : > { %2171 = vmatmul.mubr.f32.gmra.mrb[92].mxu0 %v1819_v11  ;;  %v1820_v14 = vmul.f32 %v1787_v34, %v1495_v33 }
 0x211   : > { %2175 = vmatprep.mubr.f32.mxu0 %v2770_v0 }
 0x214   : > { %2176 = vmatmul.mubr.f32.gmra.mrb[94].mxu0 %v1820_v14 }
 0x26b   : > { %v2022_v13 = vpop.f32.mrb[32].mxu0 }
 0x26c   : > { %v2024_v37 = vpop.f32.mrb[33].mxu0  ;;  %v2023_v50 = vadd.f32 %v4080_v36, %v2022_v13 }
 0x26e   : > { %v2181_v39 = vmax.f32 %v2023_v50, 0.0 }
 0x26f   : > { %v2027_v18 = vpop.f32.mrb[34].mxu0 }
 0x270   : > { %v2028_v51 = vadd.f32 %v4080_v36, %v2027_v18  ;;  %v2029_v17 = vpop.f32.mrb[35].mxu0 }
 0x272   : > { %v2182_v58 = vmax.f32 %v2028_v51, 0.0 }
 0x273   : > { %v2032_v40 = vpop.f32.mrb[36].mxu0 }
 0x274   : > { %v2774_v20 = vpack.c.bf16 %v2182_v58, %v2181_v39  ;;  %v2034_v41 = vpop.f32.mrb[37].mxu0  ;;  %v2033_v56 = vadd.f32 %v4080_v36, %v2032_v40 }
 0x276   : > { %2775 = vst [vmem:[%s4085_s7] sm:$0xff] %v2774_v20   ;;  %v2183_v47 = vmax.f32 %v2033_v56, 0.0 }
 0x277   : > { %v2037_v44 = vpop.f32.mrb[38].mxu0 }
 0x278   : > { %v2038_v23 = vadd.f32 %v4080_v36, %v2037_v44  ;;  %v2039_v46 = vpop.f32.mrb[39].mxu0 }
 0x27a   : > { %v2184_v49 = vmax.f32 %v2038_v23, 0.0 }
 0x27b   : > { %v2042_v52 = vpop.f32.mrb[40].mxu0 }
 0x27c   : > { %v2779_v53 = vpack.c.bf16 %v2184_v49, %v2183_v47  ;;  %v2044_v55 = vpop.f32.mrb[41].mxu0  ;;  %v2043_v54 = vadd.f32 %v4080_v36, %v2042_v52 }
 0x27e   : > { %2866 = vst [vmem:[%s4085_s7 + $0x8] sm:$0xff] %v2779_v53   ;;  %v2185_v32 = vmax.f32 %v2043_v54, 0.0 }
 0x27f   : > { %v2047_v26 = vpop.f32.mrb[42].mxu0 }
 0x280   : > { %v2048_v61 = vadd.f32 %v4080_v36, %v2047_v26  ;;  %v2049_v2 = vpop.f32.mrb[43].mxu0 }
 0x282   : > { %v2186_v57 = vmax.f32 %v2048_v61, 0.0 }
 0x283   : > { %v2052_v4 = vpop.f32.mrb[44].mxu0 }
 0x284   : > { %v2784_v62 = vpack.c.bf16 %v2186_v57, %v2185_v32  ;;  %v2054_v35 = vpop.f32.mrb[45].mxu0  ;;  %v2053_v30 = vadd.f32 %v4080_v36, %v2052_v4 }
 0x286   : > { %2867 = vst [vmem:[%s4085_s7 + $0x10] sm:$0xff] %v2784_v62   ;;  %v2187_v3 = vmax.f32 %v2053_v30, 0.0 }
 0x287   : > { %v2057_v1 = vpop.f32.mrb[46].mxu0 }
 0x288   : > { %v2058_v10 = vadd.f32 %v4080_v36, %v2057_v1  ;;  %v2059_v43 = vpop.f32.mrb[47].mxu0 }
 0x28a   : > { %v2188_v5 = vmax.f32 %v2058_v10, 0.0 }
 0x28b   : > { %v2062_v7 = vpop.f32.mrb[48].mxu0 }
 0x28c   : > { %v2789_v6 = vpack.c.bf16 %v2188_v5, %v2187_v3  ;;  %v2064_v60 = vpop.f32.mrb[49].mxu0  ;;  %v2063_v9 = vadd.f32 %v4080_v36, %v2062_v7 }
 0x28e   : > { %2868 = vst [vmem:[%s4085_s7 + $0x18] sm:$0xff] %v2789_v6   ;;  %v2189_v63 = vmax.f32 %v2063_v9, 0.0 }
 0x28f   : > { %v2067_v45 = vpop.f32.mrb[50].mxu0 }
 0x290   : > { %v2068_v12 = vadd.f32 %v4080_v36, %v2067_v45  ;;  %v2069_v15 = vpop.f32.mrb[51].mxu0 }
 0x292   : > { %v2190_v48 = vmax.f32 %v2068_v12, 0.0 }
 0x293   : > { %v2072_v16 = vpop.f32.mrb[52].mxu0 }
 0x294   : > { %v2794_v38 = vpack.c.bf16 %v2190_v48, %v2189_v63  ;;  %v2074_v22 = vpop.f32.mrb[53].mxu0  ;;  %v2073_v19 = vadd.f32 %v4080_v36, %v2072_v16 }
 0x296   : > { %2869 = vst [vmem:[%s4085_s7 + $0x20] sm:$0xff] %v2794_v38   ;;  %v2191_v42 = vmax.f32 %v2073_v19, 0.0 }
 0x297   : > { %v2077_v21 = vpop.f32.mrb[54].mxu0 }
 0x298   : > { %v2078_v24 = vadd.f32 %v4080_v36, %v2077_v21  ;;  %v2079_v28 = vpop.f32.mrb[55].mxu0 }
 0x29a   : > { %v2192_v25 = vmax.f32 %v2078_v24, 0.0 }
 0x29b   : > { %v2082_v27 = vpop.f32.mrb[56].mxu0 }
 0x29c   : > { %v2799_v8 = vpack.c.bf16 %v2192_v25, %v2191_v42  ;;  %v2084_v59 = vpop.f32.mrb[57].mxu0  ;;  %v2083_v29 = vadd.f32 %v4080_v36, %v2082_v27 }
 0x29e   : > { %2870 = vst [vmem:[%s4085_s7 + $0x28] sm:$0xff] %v2799_v8   ;;  %v2193_v11 = vmax.f32 %v2083_v29, 0.0 }
 0x29f   : > { %v2087_v31 = vpop.f32.mrb[58].mxu0 }
 0x2a0   : > { %v2088_v0 = vadd.f32 %v4080_v36, %v2087_v31  ;;  %v2089_v33 = vpop.f32.mrb[59].mxu0 }
 0x2a2   : > { %v2194_v34 = vmax.f32 %v2088_v0, 0.0 }
 0x2a3   : > { %v2092_v14 = vpop.f32.mrb[60].mxu0 }
 0x2a4   : > { %v2804_v13 = vpack.c.bf16 %v2194_v34, %v2193_v11  ;;  %v2094_v37 = vpop.f32.mrb[61].mxu0  ;;  %v2093_v50 = vadd.f32 %v4080_v36, %v2092_v14 }
 0x2a6   : > { %2871 = vst [vmem:[%s4085_s7 + $0x30] sm:$0xff] %v2804_v13   ;;  %v2195_v39 = vmax.f32 %v2093_v50, 0.0 }
 0x2a7   : > { %v2097_v18 = vpop.f32.mrb[62].mxu0 }
 0x2a8   : > { %v2098_v51 = vadd.f32 %v4080_v36, %v2097_v18  ;;  %v2099_v17 = vpop.f32.mrb[63].mxu0 }
 0x2aa   : > { %v2196_v58 = vmax.f32 %v2098_v51, 0.0 }
 0x2ab   : > { %v2102_v40 = vpop.f32.mrb[64].mxu0 }
 0x2ac   : > { %v2809_v20 = vpack.c.bf16 %v2196_v58, %v2195_v39  ;;  %v2104_v41 = vpop.f32.mrb[65].mxu0  ;;  %v2103_v56 = vadd.f32 %v4080_v36, %v2102_v40 }
 0x2ae   : > { %2872 = vst [vmem:[%s4085_s7 + $0x38] sm:$0xff] %v2809_v20   ;;  %v2197_v47 = vmax.f32 %v2103_v56, 0.0 }
 0x2af   : > { %v2107_v44 = vpop.f32.mrb[66].mxu0 }
 0x2b0   : > { %v2108_v23 = vadd.f32 %v4080_v36, %v2107_v44  ;;  %v2109_v46 = vpop.f32.mrb[67].mxu0 }
 0x2b2   : > { %v2198_v49 = vmax.f32 %v2108_v23, 0.0 }
 0x2b3   : > { %v2112_v52 = vpop.f32.mrb[68].mxu0 }
 0x2b4   : > { %v2814_v53 = vpack.c.bf16 %v2198_v49, %v2197_v47  ;;  %v2114_v55 = vpop.f32.mrb[69].mxu0  ;;  %v2113_v54 = vadd.f32 %v4080_v36, %v2112_v52 }
 0x2b6   : > { %2873 = vst [vmem:[%s4085_s7 + $0x40] sm:$0xff] %v2814_v53   ;;  %v2199_v32 = vmax.f32 %v2113_v54, 0.0 }
 0x2b7   : > { %v2117_v26 = vpop.f32.mrb[70].mxu0 }
 0x2b8   : > { %v2118_v61 = vadd.f32 %v4080_v36, %v2117_v26  ;;  %v2119_v2 = vpop.f32.mrb[71].mxu0 }
 0x2ba   : > { %v2200_v57 = vmax.f32 %v2118_v61, 0.0 }
 0x2bb   : > { %v2122_v4 = vpop.f32.mrb[72].mxu0 }
 0x2bc   : > { %v2819_v62 = vpack.c.bf16 %v2200_v57, %v2199_v32  ;;  %v2124_v35 = vpop.f32.mrb[73].mxu0  ;;  %v2123_v30 = vadd.f32 %v4080_v36, %v2122_v4 }
 0x2be   : > { %2874 = vst [vmem:[%s4085_s7 + $0x48] sm:$0xff] %v2819_v62   ;;  %v2201_v3 = vmax.f32 %v2123_v30, 0.0 }
 0x2bf   : > { %v2127_v1 = vpop.f32.mrb[74].mxu0 }
 0x2c0   : > { %v2128_v10 = vadd.f32 %v4080_v36, %v2127_v1  ;;  %v2129_v43 = vpop.f32.mrb[75].mxu0 }
 0x2c2   : > { %v2202_v5 = vmax.f32 %v2128_v10, 0.0 }
 0x2c3   : > { %v2132_v7 = vpop.f32.mrb[76].mxu0 }
 0x2c4   : > { %v2824_v6 = vpack.c.bf16 %v2202_v5, %v2201_v3  ;;  %v2134_v60 = vpop.f32.mrb[77].mxu0  ;;  %v2133_v9 = vadd.f32 %v4080_v36, %v2132_v7 }
 0x2c6   : > { %2875 = vst [vmem:[%s4085_s7 + $0x50] sm:$0xff] %v2824_v6   ;;  %v2203_v63 = vmax.f32 %v2133_v9, 0.0 }
 0x2c7   : > { %v2137_v45 = vpop.f32.mrb[78].mxu0 }
 0x2c8   : > { %v2138_v12 = vadd.f32 %v4080_v36, %v2137_v45  ;;  %v2139_v15 = vpop.f32.mrb[79].mxu0 }
 0x2ca   : > { %v2204_v48 = vmax.f32 %v2138_v12, 0.0 }
 0x2cb   : > { %v2142_v16 = vpop.f32.mrb[80].mxu0 }
 0x2cc   : > { %v2829_v38 = vpack.c.bf16 %v2204_v48, %v2203_v63  ;;  %v2144_v22 = vpop.f32.mrb[81].mxu0  ;;  %v2143_v19 = vadd.f32 %v4080_v36, %v2142_v16 }
 0x2ce   : > { %2876 = vst [vmem:[%s4085_s7 + $0x58] sm:$0xff] %v2829_v38   ;;  %v2205_v42 = vmax.f32 %v2143_v19, 0.0 }
 0x2cf   : > { %v2147_v21 = vpop.f32.mrb[82].mxu0 }
 0x2d0   : > { %v2148_v24 = vadd.f32 %v4080_v36, %v2147_v21  ;;  %v2149_v28 = vpop.f32.mrb[83].mxu0 }
 0x2d2   : > { %v2206_v25 = vmax.f32 %v2148_v24, 0.0 }
 0x2d3   : > { %v2152_v27 = vpop.f32.mrb[84].mxu0 }
 0x2d4   : > { %v2834_v8 = vpack.c.bf16 %v2206_v25, %v2205_v42  ;;  %v2154_v59 = vpop.f32.mrb[85].mxu0  ;;  %v2153_v29 = vadd.f32 %v4080_v36, %v2152_v27 }
 0x2d6   : > { %2877 = vst [vmem:[%s4085_s7 + $0x60] sm:$0xff] %v2834_v8   ;;  %v2207_v11 = vmax.f32 %v2153_v29, 0.0 }
 0x2d7   : > { %v2157_v31 = vpop.f32.mrb[86].mxu0 }
 0x2d8   : > { %v2158_v0 = vadd.f32 %v4080_v36, %v2157_v31  ;;  %v2159_v33 = vpop.f32.mrb[87].mxu0 }
 0x2da   : > { %v2208_v34 = vmax.f32 %v2158_v0, 0.0 }
 0x2db   : > { %v2162_v14 = vpop.f32.mrb[88].mxu0 }
 0x2dc   : > { %v2839_v13 = vpack.c.bf16 %v2208_v34, %v2207_v11  ;;  %v2164_v37 = vpop.f32.mrb[89].mxu0  ;;  %v2163_v50 = vadd.f32 %v4080_v36, %v2162_v14 }
 0x2de   : > { %2878 = vst [vmem:[%s4085_s7 + $0x68] sm:$0xff] %v2839_v13   ;;  %v2209_v39 = vmax.f32 %v2163_v50, 0.0 }
 0x2df   : > { %v2167_v18 = vpop.f32.mrb[90].mxu0 }
 0x2e0   : > { %v2168_v51 = vadd.f32 %v4080_v36, %v2167_v18  ;;  %v2169_v17 = vpop.f32.mrb[91].mxu0 }
 0x2e2   : > { %v2210_v58 = vmax.f32 %v2168_v51, 0.0 }
 0x2e3   : > { %v2172_v40 = vpop.f32.mrb[92].mxu0 }
 0x2e4   : > { %v2844_v20 = vpack.c.bf16 %v2210_v58, %v2209_v39  ;;  %v2174_v41 = vpop.f32.mrb[93].mxu0  ;;  %v2173_v56 = vadd.f32 %v4080_v36, %v2172_v40 }
 0x2e6   : > { %2879 = vst [vmem:[%s4085_s7 + $0x70] sm:$0xff] %v2844_v20   ;;  %v2211_v47 = vmax.f32 %v2173_v56, 0.0 }
 0x2e7   : > { %v2177_v44 = vpop.f32.mrb[94].mxu0 }
 0x2e8   : > { %v2178_v23 = vadd.f32 %v4080_v36, %v2177_v44  ;;  %v2179_v46 = vpop.f32.mrb[95].mxu0 }
 0x2ea   : > { %v2212_v49 = vmax.f32 %v2178_v23, 0.0 }
 0x2ec   : > { %v2849_v52 = vpack.c.bf16 %v2212_v49, %v2211_v47 }
 0x2ee   : > { %2880 = vst [vmem:[%s4085_s7 + $0x78] sm:$0xff] %v2849_v52  }
 0x2ef   : > { %3451 = shalt.err (!%p3448_p9)
}
 0x2f0   : > { %s3452_s27 = scalar_lea.hbm %s4137_s11, 2048  ;;  %s3456_s7 = scalar_lea.hbm %s4195_s6, 4096 }
 0x2f1   : > { %p3453_p1 = scmp.ne.s32.totalorder %s4137_s11, %s3452_s27  ;;  %p3457_p7 = scmp.lt.u32.totalorder %s4137_s11, %s4195_s6 }
 0x2f2   : > { %p3458_p13 = scmp.lt.u32.totalorder %s3456_s7, %s3452_s27  ;;  %p3460_p6 = scmp.lt.u32.totalorder %s3452_s27, %s4137_s11 }
 0x2f3   : > { %p3454_p2 = pnand %p3453_p1, %p3668_p10 }
 0x2f4   : > { %p3459_p4 = por %p3458_p13, %p3457_p7 }
 0x2f5   : > { %p3455_p3 = pneg %p3454_p2 }
 0x2f6   : > { %p3461_p8 = por %p3460_p6, %p3459_p4 }
 0x2f8   : > { %p3462_p12 = pnand %p3461_p8, %p3455_p3 }
 0x2fa   : > { %3465 = shalt.err (!%p3462_p12)
}
 0x2fb   : > { %s3535_s17 = smov 64   ;;  %s3536_s9 = smov 4  }
 0x2fc   : > { %3175 = dma.vmem_to_hbm [thread:$0]  (%p3668_p10), %s4139_s10, 2048, %s4137_s11, %s2374_s19, %s3535_s17, %s3535_s17, %s3536_s9  }
 0x2fd PF: > { %s2402_s24 = sand.u32 1, %s3504_s21   ;;  %p4213_p11 = scmp.ne.s32.totalorder %s4203_s8, 0 }
 0x2fe   : > { %p4214_p0 = scmp.ge.s32.totalorder %s3524_s26, 2  ;;  %s2403_s14 = scalar_lea.sflag [#allocation5], %s2402_s24 }
 0x300   : > { %p3186_p5 = pnand %p4214_p0, %p4213_p11 }
 0x302   : > { %3499 = dma.done.wait (!%p3186_p5), %s2403_s14, 2048  }
 0x303   : > { %3501 = vsyncadd (!%p3186_p5), %s2403_s14, 4294965248  ;;  %s23_s26 = sadd.s32 1, %s3524_s26   ;;  %s4215_s21 = smov %s3508_s22 }
 0x304   : > { %p20_p9 = scmp.ge.s32.totalorder %s23_s26, 4   ;;  %s4216_s22 = smov %s3512_s23 }
 0x305   : > { %s4217_s23 = smov %s3677_s20  ;;  %s4218_s24 = smov %s3520_s25 }
 0x306   : > { %s4219_s25 = smov %s4221_s13  ;;  %22 = sbr.rel (!%p20_p9) target bundleno = 7 (0x7), region = 110 }
 0x30d   :  { %2408 = vsyncpa [#allocation4], 1 }
 0x30e   :  { %2410 = vsyncpa [#allocation4 + $0x1], 1 }
 0x30f   :  { %2411 = vsyncpa [#allocation7], 1 }
 0x310   :  { %2412 = vsyncpa [#allocation5], 1 }
 0x311   :  { %2414 = vsyncpa [#allocation5 + $0x1], 1 }

</bundles_post_ra>
